<compile_context>
chip_gen: v7x
topology: tpu7x:2x2x1
jax: 0.10.0
libtpu: 0.0.40
codegen_flags: <defaults>
</compile_context>

<pallas_src>
import jax
import jax.numpy as jnp
from jax.experimental import pallas as pl
from jax.experimental.pallas import tpu as pltpu

# ----------------------------- model hyper-parameters -----------------------------
NV1 = 64
NV2 = 64
BNECK = 16
VS = [32, 16, 8]     # length sequence
FS = [8, 16, 32]     # channel sequence
BATCH = 2

LEAKY_SLOPE = 0.01   # nn.LeakyReLU default
BN_EPS = 1e-5        # nn.BatchNorm1d default
PACK_W = 128         # lane width of the packed parameter buffer (widest entry is 128)

# (cin, cout, Lin, Lout) per SConvBlock / TConvBlock
ENC_CFG = [(3, FS[0], NV1, VS[0]), (FS[0], FS[1], VS[0], VS[1]), (FS[1], FS[2], VS[1], VS[2])]
DEC_CFG = [(FS[2], FS[1], VS[2], VS[1]), (FS[1], FS[0], VS[1], VS[0]), (FS[0], 3, VS[0], NV2)]


def _round8(n):
    return -(-n // 8) * 8


# ------------------------- host-side parameter packing (once, at build time) -------------------------
def pack_params(p):
    """Re-pack PyTorch-layout parameters into one (rows, 128) f32 buffer + static offsets.
    NOTE: every entry bakes BATCH in; the batched kron(I_B, W^T) expansion grows O(B^2) —
    for large batches, switch to a parallel grid axis over batch groups instead."""
    entries = []

    def add(name, arr):
        arr = jnp.asarray(arr, jnp.float32)
        assert arr.ndim == 2 and arr.shape[1] <= PACK_W, (name, arr.shape)
        entries.append((name, arr))

    def boundary_masks(L):                       # zero the rolled column that crosses a sample edge
        t = jnp.arange(BATCH * L) % L
        return ((t != 0).astype(jnp.float32).reshape(1, -1),
                (t != L - 1).astype(jnp.float32).reshape(1, -1))

    def lin_bias2d(lin_w, lin_b, conv_b):
        # Conv bias (constant over length) composed through the per-length Linear (exact).
        lin_w = jnp.asarray(lin_w, jnp.float32)
        rowsum = jnp.sum(lin_w, axis=1)                                      # (Lout,)
        b2d = (jnp.asarray(lin_b, jnp.float32)[None, :]
               + jnp.asarray(conv_b, jnp.float32)[:, None] * rowsum[None, :])  # (cout, Lout)
        return jnp.tile(b2d, (1, BATCH))                                     # (cout, B*Lout)

    eyeB = jnp.eye(BATCH, dtype=jnp.float32)

    # ----- encoder SConvBlocks: conv weights tap-stacked along the CONTRACTION dim -----
    for i, (cin, cout, lin_, lout) in enumerate(ENC_CFG, 1):
        w = jnp.asarray(p[f"e{i}_conv_w"], jnp.float32)                      # (cout, cin, 3)
        add(f"e{i}_convw", jnp.concatenate([w[:, :, 0], w[:, :, 1], w[:, :, 2]], axis=1))  # (cout, 3*cin)
        mprev, mnext = boundary_masks(lin_)
        add(f"e{i}_mprev", mprev)
        add(f"e{i}_mnext", mnext)
        add(f"e{i}_linw", jnp.kron(eyeB, jnp.asarray(p[f"e{i}_lin_w"], jnp.float32).T))  # (B*Lin, B*Lout)
        add(f"e{i}_linb", lin_bias2d(p[f"e{i}_lin_w"], p[f"e{i}_lin_b"], p[f"e{i}_conv_b"]))
        add(f"e{i}_bng", p[f"e{i}_bn_g"].reshape(cout, 1))
        add(f"e{i}_bnb", p[f"e{i}_bn_b"].reshape(cout, 1))

    # ----- Flatten + Linear(flat->bneck) + fused fc_mu/fc_logvar, batched & matmul-only -----
    # torch flatten index f = c*VS2 + v ;  kernel activation layout h[c, b*VS2 + v].
    Wr = p["enc_fc_w"].reshape(BNECK, FS[2], VS[2])                          # [m, c, v]
    add("fc_wmat", jnp.transpose(Wr, (2, 0, 1)).reshape(VS[2] * BNECK, FS[2]))   # row v*BNECK+m
    rfc = jnp.arange(VS[2] * BNECK)[:, None] // BNECK                        # v of each row
    cfc = jnp.arange(BATCH * VS[2])[None, :] % VS[2]                         # v' of each column
    add("fc_mask", (rfc == cfc).astype(jnp.float32))                         # keep v == v'
    add("fc_sel", jnp.repeat(eyeB, VS[2], axis=0))                           # (B*VS2, B)
    S = jnp.tile(jnp.eye(BNECK, dtype=jnp.float32), (1, VS[2]))              # sums the v row-blocks
    bfc = p["enc_fc_b"].reshape(BNECK, 1)
    add("muv_w", jnp.concatenate([p["mu_w"] @ S, p["lv_w"] @ S], axis=0))    # (2*BNECK, VS2*BNECK)
    add("muv_b", jnp.concatenate([p["mu_w"] @ bfc + p["mu_b"].reshape(-1, 1),
                                  p["lv_w"] @ bfc + p["lv_b"].reshape(-1, 1)], axis=0))

    # ----- decoder1: Linear(bneck->flat) + Reshape(FS2, VS2), batched & matmul-only -----
    Wd = p["dec1_w"].reshape(FS[2], VS[2], BNECK)                            # [c, v, m]
    add("d1_wflat", jnp.transpose(Wd, (0, 2, 1)).reshape(FS[2], BNECK * VS[2]))   # col m*VS2+v
    add("d1_arep", jnp.kron(jnp.eye(BNECK, dtype=jnp.float32),
                            jnp.ones((VS[2], 1), jnp.float32)))              # (BNECK*VS2, BNECK)
    add("d1_rexp", jnp.repeat(eyeB, VS[2], axis=1))                          # (B, B*VS2)
    rv = jnp.arange(BNECK * VS[2])[:, None] % VS[2]
    add("d1_mask", (rv == cfc).astype(jnp.float32))                          # keep v == v'
    add("d1_bias", jnp.tile(p["dec1_b"].reshape(FS[2], VS[2]), (1, BATCH)))  # (FS2, B*VS2)

    # ----- decoder2 TConvBlocks (ConvTranspose1d -> equivalent Conv1d on host), output-shift form -----
    for i, (cin, cout, lin_, lout) in enumerate(DEC_CFG, 1):
        w_ct = jnp.asarray(p[f"d{i}_conv_w"], jnp.float32)                   # (cin, cout, 3)
        w_conv = jnp.transpose(jnp.flip(w_ct, axis=-1), (1, 0, 2))           # (cout, cin, 3)
        cpad = _round8(cout)
        wcat = jnp.zeros((3 * cpad, cin), jnp.float32)
        for k in range(3):
            wcat = wcat.at[k * cpad:k * cpad + cout, :].set(w_conv[:, :, k])
        add(f"d{i}_convw", wcat)
        mprev, mnext = boundary_masks(lin_)
        add(f"d{i}_mprev", mprev)
        add(f"d{i}_mnext", mnext)
        add(f"d{i}_linw", jnp.kron(eyeB, jnp.asarray(p[f"d{i}_lin_w"], jnp.float32).T))
        add(f"d{i}_linb", lin_bias2d(p[f"d{i}_lin_w"], p[f"d{i}_lin_b"], p[f"d{i}_conv_b"]))

    # lay the entries out at 8-row-aligned offsets in one (rows, PACK_W) buffer
    offs, row = {}, 0
    for name, arr in entries:
        r, c = arr.shape
        offs[name] = (row, r, c)
        row += _round8(r)
    buf = jnp.zeros((row, PACK_W), jnp.float32)
    for name, arr in entries:
        r0, r, c = offs[name]
        buf = buf.at[r0:r0 + r, :c].set(arr)
    return buf, offs


# ----------------------------------- the kernel -----------------------------------
def make_kernel(offs):
    def kernel(x_ref, epsT_ref, pk_ref, out_ref):
        def P(name):                               # static window load from the packed buffer
            r0, r, c = offs[name]
            return pk_ref[r0:r0 + r, 0:c]

        def lrelu(v):
            return jnp.where(v >= 0.0, v, LEAKY_SLOPE * v)

        def shift_prev(a, m):                      # value at t-1 aligned to column t (XLU rotate)
            return pltpu.roll(a, shift=1, axis=1) * m

        def shift_next(a, m):                      # value at t+1 aligned to column t
            return pltpu.roll(a, shift=a.shape[1] - 1, axis=1) * m

        # ---------- encoder: 3x [conv -> linear(length) -> LeakyReLU -> BatchNorm] ----------
        h = x_ref[...]                                                        # (3, B*NV1) f32
        for i, (cin, cout, lin_, lout) in enumerate(ENC_CFG, 1):
            mprev, mnext = P(f"e{i}_mprev"), P(f"e{i}_mnext")
            # Conv1d(k=3, pad=1): stack the 3 shifted tap inputs along channels -> ONE deep matmul.
            hstk = jnp.concatenate([shift_prev(h, mprev), h, shift_next(h, mnext)], axis=0)
            y = jnp.dot(P(f"e{i}_convw"), hstk, preferred_element_type=jnp.float32)   # (cout, B*Lin)
            # per-length Linear (block-diag over batch); conv bias is pre-composed into linb.
            y = jnp.dot(y, P(f"e{i}_linw"),
                        preferred_element_type=jnp.float32) + P(f"e{i}_linb")         # (cout, B*Lout)
            y = lrelu(y)
            # BatchNorm1d training mode: biased stats over (batch, length) = all lanes, one sweep.
            n = y.shape[1]
            s1 = jnp.sum(y, axis=1, keepdims=True)
            s2 = jnp.sum(y * y, axis=1, keepdims=True)
            mean = s1 * (1.0 / n)
            var = jnp.maximum(s2 * (1.0 / n) - mean * mean, 0.0)
            scale = P(f"e{i}_bng") * jax.lax.rsqrt(var + BN_EPS)
            h = y * scale + (P(f"e{i}_bnb") - mean * scale)
        # TODO(synk): BatchNorm running-stat updates (training-time side effect) are not materialized.

        # ---------- Flatten + Linear(flat->bneck) + fused fc_mu/fc_logvar ----------
        Pm = jnp.dot(P("fc_wmat"), h, preferred_element_type=jnp.float32) * P("fc_mask")
        R = jnp.dot(Pm, P("fc_sel"), preferred_element_type=jnp.float32)      # (VS2*BNECK, B)
        mulv = jnp.dot(P("muv_w"), R, preferred_element_type=jnp.float32) + P("muv_b")
        mu = mulv[0:BNECK]
        lv = mulv[BNECK:2 * BNECK]
        z = mu + epsT_ref[...] * jnp.exp(0.5 * lv)                            # (BNECK, B)

        # decoder1: Linear(bneck -> FS2*VS2) + per-sample Reshape(FS2, VS2), kept as (FS2, B*VS2)
        Zr = jnp.dot(P("d1_arep"), z, preferred_element_type=jnp.float32)     # (BNECK*VS2, B)
        Zrep = jnp.dot(Zr, P("d1_rexp"), preferred_element_type=jnp.float32) * P("d1_mask")
        d = jnp.dot(P("d1_wflat"), Zrep, preferred_element_type=jnp.float32) + P("d1_bias")

        # ---------- decoder2: 3x [tconv -> linear(length) -> LeakyReLU (Identity last)] ----------
        for i, (cin, cout, lin_, lout) in enumerate(DEC_CFG, 1):
            wcat = P(f"d{i}_convw")
            cpad = wcat.shape[0] // 3
            A = jnp.dot(wcat, d, preferred_element_type=jnp.float32)          # (3*cpad, B*Lin)
            mprev, mnext = P(f"d{i}_mprev"), P(f"d{i}_mnext")
            d = (A[cpad:cpad + cout]
                 + shift_prev(A[0:cout], mprev)
                 + shift_next(A[2 * cpad:2 * cpad + cout], mnext))
            d = jnp.dot(d, P(f"d{i}_linw"),
                        preferred_element_type=jnp.float32) + P(f"d{i}_linb")
            if i != 3:
                d = lrelu(d)                       # last TConvBlock: Identity act, never BN/dropout

        out_ref[...] = d.astype(out_ref.dtype)     # (3, B*NV2) = (3, 128), lane-dense single store

    return kernel


# ------------------------------- build-once wrapper -------------------------------
def build_meshvae_forward(params):
    """Pack parameters and build the pallas_call + jitted forward exactly once."""
    pack, offs = pack_params(params)
    kernel = make_kernel(offs)
    cost = pl.CostEstimate(
        flops=1_200_000,
        transcendentals=128,
        bytes_accessed=int(pack.size * 4 + 3 * BATCH * NV1 * 4 + BNECK * BATCH * 4 + 3 * BATCH * NV2 * 4),
    )
    call = pl.pallas_call(
        kernel,
        out_shape=jax.ShapeDtypeStruct((3, BATCH * NV2), jnp.float32),
        in_specs=[pl.BlockSpec(memory_space=pltpu.MemorySpace.VMEM)] * 3,
        out_specs=pl.BlockSpec(memory_space=pltpu.MemorySpace.VMEM),
        cost_estimate=cost,
    )

    @jax.jit
    def forward(x, eps):
        # channels-first with batch folded into the lane dim: column index = b*NV1 + t
        xcf = jnp.transpose(x.astype(jnp.float32), (2, 0, 1)).reshape(3, BATCH * NV1)
        epsT = jnp.transpose(eps.astype(jnp.float32))                         # (BNECK, B)
        out = call(xcf, epsT, pack)
        # back to the module's (B, NV2, 3) output layout (final Permute(1,0)) + dtype cast
        return out.reshape(3, BATCH, NV2).transpose(1, 2, 0).astype(x.dtype)

    return forward


# ----------------------------- deterministic parameters -----------------------------
def init_params(key):
    keys = iter(jax.random.split(key, 64))

    def nrm(shape, scale=0.05):
        return scale * jax.random.normal(next(keys), shape, jnp.float32)

    p = {}
    for i, (ci, co, vi, vo) in enumerate(ENC_CFG, 1):
        p[f"e{i}_conv_w"] = nrm((co, ci, 3))          # PyTorch Conv1d weight (out, in, k)
        p[f"e{i}_conv_b"] = nrm((co,))
        p[f"e{i}_lin_w"] = nrm((vo, vi))              # nn.Linear (out, in)
        p[f"e{i}_lin_b"] = nrm((vo,))
        p[f"e{i}_bn_g"] = 1.0 + nrm((co,))
        p[f"e{i}_bn_b"] = nrm((co,))
    flat = FS[2] * VS[2]
    p["enc_fc_w"] = nrm((BNECK, flat)); p["enc_fc_b"] = nrm((BNECK,))
    p["mu_w"] = nrm((BNECK, BNECK));    p["mu_b"] = nrm((BNECK,))
    p["lv_w"] = nrm((BNECK, BNECK));    p["lv_b"] = nrm((BNECK,))
    p["dec1_w"] = nrm((flat, BNECK));   p["dec1_b"] = nrm((flat,))
    for i, (ci, co, vi, vo) in enumerate(DEC_CFG, 1):
        p[f"d{i}_conv_w"] = nrm((ci, co, 3))          # PyTorch ConvTranspose1d weight (in, out, k)
        p[f"d{i}_conv_b"] = nrm((co,))
        p[f"d{i}_lin_w"] = nrm((vo, vi))
        p[f"d{i}_lin_b"] = nrm((vo,))
    return p


# ------------------------------- pure-JAX reference -------------------------------
def ref_forward(x, eps, p):
    h = jnp.transpose(x.astype(jnp.float32), (0, 2, 1))          # (B, 3, NV1)

    def conv1d(h, w, b):                                          # w (Cout, Cin, 3), pad=1
        L = h.shape[-1]
        hp = jnp.pad(h, ((0, 0), (0, 0), (1, 1)))
        y = sum(jnp.einsum("oi,bil->bol", w[:, :, k], hp[:, :, k:k + L],
                           preferred_element_type=jnp.float32) for k in range(3))
        return y + b.reshape(1, -1, 1)

    def convT1d(h, w, b):                                         # w (Cin, Cout, 3), stride 1, pad 1
        wc = jnp.transpose(jnp.flip(w, axis=-1), (1, 0, 2))
        return conv1d(h, wc, b)

    def lin(h, w, b):
        return jnp.einsum("bcl,ml->bcm", h, w,
                          preferred_element_type=jnp.float32) + b.reshape(1, 1, -1)

    def lrelu(h):
        return jnp.where(h >= 0, h, LEAKY_SLOPE * h)

    def bn(h, g, bt):
        m = jnp.mean(h, axis=(0, 2), keepdims=True)
        v = jnp.mean((h - m) ** 2, axis=(0, 2), keepdims=True)
        return (h - m) * jax.lax.rsqrt(v + BN_EPS) * g.reshape(1, -1, 1) + bt.reshape(1, -1, 1)

    for i in (1, 2, 3):
        h = bn(lrelu(lin(conv1d(h, p[f"e{i}_conv_w"], p[f"e{i}_conv_b"]),
                         p[f"e{i}_lin_w"], p[f"e{i}_lin_b"])),
               p[f"e{i}_bn_g"], p[f"e{i}_bn_b"])
    hb = h.reshape(h.shape[0], -1)
    z0 = hb @ p["enc_fc_w"].T + p["enc_fc_b"]
    mu = z0 @ p["mu_w"].T + p["mu_b"]
    logvar = z0 @ p["lv_w"].T + p["lv_b"]
    z = mu + eps * jnp.exp(0.5 * logvar)
    d = (z @ p["dec1_w"].T + p["dec1_b"]).reshape(-1, FS[2], VS[2])
    for i in (1, 2, 3):
        d = lin(convT1d(d, p[f"d{i}_conv_w"], p[f"d{i}_conv_b"]),
                p[f"d{i}_lin_w"], p[f"d{i}_lin_b"])
        if i != 3:
            d = lrelu(d)
    return jnp.transpose(d, (0, 2, 1)).astype(x.dtype)


if __name__ == "__main__":
    key = jax.random.PRNGKey(0)
    kx, keps, kp = jax.random.split(key, 3)
    x = jax.random.normal(kx, (BATCH, NV1, 3), jnp.float32)        # mesh vertices
    eps = jax.random.normal(keps, (BATCH, BNECK), jnp.float32)     # reparameterization noise
    params = init_params(kp)

    forward = build_meshvae_forward(params)                        # pack + trace + compile ONCE
    out = jax.block_until_ready(forward(x, eps))                   # first call compiles
    out = jax.block_until_ready(forward(x, eps))                   # subsequent calls hit the cache
    assert out.shape == (BATCH, NV2, 3) and out.dtype == x.dtype

    ref = jax.block_until_ready(ref_forward(x, eps, params))
    assert jnp.allclose(out, ref, atol=3e-3, rtol=2e-2), float(jnp.max(jnp.abs(out - ref)))

    print("KERNEL_OK")
</pallas_src>

<mosaic_0001>
module attributes {stable_mosaic.version = 11 : i64} {
  func.func @kernel(%arg0: memref<3x128xf32, #tpu.memory_space<vmem>>, %arg1: memref<16x2xf32, #tpu.memory_space<vmem>>, %arg2: memref<1448x128xf32, #tpu.memory_space<vmem>>, %arg3: memref<3x128xf32, #tpu.memory_space<vmem>>) attributes {dimension_semantics = [], scalar_prefetch = 0 : i64, scratch_operands = 0 : i64, tpu.core_type = #tpu.core_type<tc>} {
    %c0 = arith.constant 0 : index
    %c0_0 = arith.constant 0 : index
    %0 = vector.load %arg0[%c0, %c0_0] : memref<3x128xf32, #tpu.memory_space<vmem>>, vector<3x128xf32>
    %c8 = arith.constant 8 : index
    %c0_1 = arith.constant 0 : index
    %1 = vector.load %arg2[%c8, %c0_1] : memref<1448x128xf32, #tpu.memory_space<vmem>>, vector<1x128xf32>
    %c16 = arith.constant 16 : index
    %c0_2 = arith.constant 0 : index
    %2 = vector.load %arg2[%c16, %c0_2] : memref<1448x128xf32, #tpu.memory_space<vmem>>, vector<1x128xf32>
    %c1_i32 = arith.constant 1 : i32
    %3 = tpu.dynamic_rotate %0 by %c1_i32 dim 1 : vector<3x128xf32>, i32 -> vector<3x128xf32>
    %4 = vector.broadcast %1 : vector<1x128xf32> to vector<3x128xf32>
    %5 = arith.mulf %3, %4 : vector<3x128xf32>
    %c127_i32 = arith.constant 127 : i32
    %6 = tpu.dynamic_rotate %0 by %c127_i32 dim 1 : vector<3x128xf32>, i32 -> vector<3x128xf32>
    %7 = vector.broadcast %2 : vector<1x128xf32> to vector<3x128xf32>
    %8 = arith.mulf %6, %7 : vector<3x128xf32>
    %9 = tpu.concatenate %5, %0, %8 in 0 : vector<3x128xf32>, vector<3x128xf32>, vector<3x128xf32> -> vector<9x128xf32>
    %c0_3 = arith.constant 0 : index
    %c0_4 = arith.constant 0 : index
    %10 = vector.load %arg2[%c0_3, %c0_4] : memref<1448x128xf32, #tpu.memory_space<vmem>>, vector<8x9xf32>
    %cst = arith.constant dense<0.000000e+00> : vector<8x128xf32>
    %11 = tpu.matmul %10, %9, %cst {dimension_numbers = #tpu.dot_dimension_numbers<[1], [0], [0], [1], [0, 0, 1, 1], [], []>} : vector<8x9xf32>, vector<9x128xf32>, vector<8x128xf32> -> vector<8x128xf32>
    %c24 = arith.constant 24 : index
    %c0_5 = arith.constant 0 : index
    %12 = vector.load %arg2[%c24, %c0_5] : memref<1448x128xf32, #tpu.memory_space<vmem>>, vector<128x64xf32>
    %cst_6 = arith.constant dense<0.000000e+00> : vector<8x64xf32>
    %13 = tpu.matmul %11, %12, %cst_6 {dimension_numbers = #tpu.dot_dimension_numbers<[1], [0], [0], [1], [0, 0, 1, 1], [], []>} : vector<8x128xf32>, vector<128x64xf32>, vector<8x64xf32> -> vector<8x64xf32>
    %c152 = arith.constant 152 : index
    %c0_7 = arith.constant 0 : index
    %14 = vector.load %arg2[%c152, %c0_7] : memref<1448x128xf32, #tpu.memory_space<vmem>>, vector<8x64xf32>
    %15 = arith.addf %13, %14 : vector<8x64xf32>
    %cst_8 = arith.constant 0.000000e+00 : f32
    %16 = vector.broadcast %cst_8 : f32 to vector<8x64xf32>
    %17 = arith.cmpf oge, %15, %16 : vector<8x64xf32>
    %cst_9 = arith.constant 0.00999999977 : f32
    %18 = vector.broadcast %cst_9 : f32 to vector<8x64xf32>
    %19 = arith.mulf %18, %15 : vector<8x64xf32>
    %20 = arith.select %17, %15, %19 : vector<8x64xi1>, vector<8x64xf32>
    %cst_10 = arith.constant dense<0.000000e+00> : vector<8xf32>
    %21 = vector.multi_reduction <add>, %20, %cst_10 [1] : vector<8x64xf32> to vector<8xf32>
    %22 = vector.shape_cast %21 : vector<8xf32> to vector<8x1xf32>
    %23 = arith.mulf %20, %20 : vector<8x64xf32>
    %cst_11 = arith.constant dense<0.000000e+00> : vector<8xf32>
    %24 = vector.multi_reduction <add>, %23, %cst_11 [1] : vector<8x64xf32> to vector<8xf32>
    %25 = vector.shape_cast %24 : vector<8xf32> to vector<8x1xf32>
    %cst_12 = arith.constant 1.562500e-02 : f32
    %26 = vector.broadcast %cst_12 : f32 to vector<8x1xf32>
    %27 = arith.mulf %22, %26 : vector<8x1xf32>
    %cst_13 = arith.constant 1.562500e-02 : f32
    %28 = vector.broadcast %cst_13 : f32 to vector<8x1xf32>
    %29 = arith.mulf %25, %28 : vector<8x1xf32>
    %30 = arith.mulf %27, %27 : vector<8x1xf32>
    %31 = arith.subf %29, %30 : vector<8x1xf32>
    %cst_14 = arith.constant 0.000000e+00 : f32
    %32 = vector.broadcast %cst_14 : f32 to vector<8x1xf32>
    %33 = arith.maximumf %31, %32 : vector<8x1xf32>
    %c160 = arith.constant 160 : index
    %c0_15 = arith.constant 0 : index
    %34 = vector.load %arg2[%c160, %c0_15] : memref<1448x128xf32, #tpu.memory_space<vmem>>, vector<8x1xf32>
    %cst_16 = arith.constant 9.99999974E-6 : f32
    %35 = vector.broadcast %cst_16 : f32 to vector<8x1xf32>
    %36 = arith.addf %33, %35 : vector<8x1xf32>
    %37 = math.rsqrt %36 : vector<8x1xf32>
    %38 = arith.mulf %34, %37 : vector<8x1xf32>
    %39 = vector.broadcast %38 : vector<8x1xf32> to vector<8x64xf32>
    %40 = arith.mulf %20, %39 : vector<8x64xf32>
    %c168 = arith.constant 168 : index
    %c0_17 = arith.constant 0 : index
    %41 = vector.load %arg2[%c168, %c0_17] : memref<1448x128xf32, #tpu.memory_space<vmem>>, vector<8x1xf32>
    %42 = arith.mulf %27, %38 : vector<8x1xf32>
    %43 = arith.subf %41, %42 : vector<8x1xf32>
    %44 = vector.broadcast %43 : vector<8x1xf32> to vector<8x64xf32>
    %45 = arith.addf %40, %44 : vector<8x64xf32>
    %c192 = arith.constant 192 : index
    %c0_18 = arith.constant 0 : index
    %46 = vector.load %arg2[%c192, %c0_18] : memref<1448x128xf32, #tpu.memory_space<vmem>>, vector<1x64xf32>
    %c200 = arith.constant 200 : index
    %c0_19 = arith.constant 0 : index
    %47 = vector.load %arg2[%c200, %c0_19] : memref<1448x128xf32, #tpu.memory_space<vmem>>, vector<1x64xf32>
    %c1_i32_20 = arith.constant 1 : i32
    %48 = tpu.dynamic_rotate %45 by %c1_i32_20 dim 1 : vector<8x64xf32>, i32 -> vector<8x64xf32>
    %49 = vector.broadcast %46 : vector<1x64xf32> to vector<8x64xf32>
    %50 = arith.mulf %48, %49 : vector<8x64xf32>
    %c63_i32 = arith.constant 63 : i32
    %51 = tpu.dynamic_rotate %45 by %c63_i32 dim 1 : vector<8x64xf32>, i32 -> vector<8x64xf32>
    %52 = vector.broadcast %47 : vector<1x64xf32> to vector<8x64xf32>
    %53 = arith.mulf %51, %52 : vector<8x64xf32>
    %54 = tpu.concatenate %50, %45, %53 in 0 : vector<8x64xf32>, vector<8x64xf32>, vector<8x64xf32> -> vector<24x64xf32>
    %c176 = arith.constant 176 : index
    %c0_21 = arith.constant 0 : index
    %55 = vector.load %arg2[%c176, %c0_21] : memref<1448x128xf32, #tpu.memory_space<vmem>>, vector<16x24xf32>
    %cst_22 = arith.constant dense<0.000000e+00> : vector<16x64xf32>
    %56 = tpu.matmul %55, %54, %cst_22 {dimension_numbers = #tpu.dot_dimension_numbers<[1], [0], [0], [1], [0, 0, 1, 1], [], []>} : vector<16x24xf32>, vector<24x64xf32>, vector<16x64xf32> -> vector<16x64xf32>
    %c208 = arith.constant 208 : index
    %c0_23 = arith.constant 0 : index
    %57 = vector.load %arg2[%c208, %c0_23] : memref<1448x128xf32, #tpu.memory_space<vmem>>, vector<64x32xf32>
    %cst_24 = arith.constant dense<0.000000e+00> : vector<16x32xf32>
    %58 = tpu.matmul %56, %57, %cst_24 {dimension_numbers = #tpu.dot_dimension_numbers<[1], [0], [0], [1], [0, 0, 1, 1], [], []>} : vector<16x64xf32>, vector<64x32xf32>, vector<16x32xf32> -> vector<16x32xf32>
    %c272 = arith.constant 272 : index
    %c0_25 = arith.constant 0 : index
    %59 = vector.load %arg2[%c272, %c0_25] : memref<1448x128xf32, #tpu.memory_space<vmem>>, vector<16x32xf32>
    %60 = arith.addf %58, %59 : vector<16x32xf32>
    %cst_26 = arith.constant 0.000000e+00 : f32
    %61 = vector.broadcast %cst_26 : f32 to vector<16x32xf32>
    %62 = arith.cmpf oge, %60, %61 : vector<16x32xf32>
    %cst_27 = arith.constant 0.00999999977 : f32
    %63 = vector.broadcast %cst_27 : f32 to vector<16x32xf32>
    %64 = arith.mulf %63, %60 : vector<16x32xf32>
    %65 = arith.select %62, %60, %64 : vector<16x32xi1>, vector<16x32xf32>
    %cst_28 = arith.constant dense<0.000000e+00> : vector<16xf32>
    %66 = vector.multi_reduction <add>, %65, %cst_28 [1] : vector<16x32xf32> to vector<16xf32>
    %67 = vector.shape_cast %66 : vector<16xf32> to vector<16x1xf32>
    %68 = arith.mulf %65, %65 : vector<16x32xf32>
    %cst_29 = arith.constant dense<0.000000e+00> : vector<16xf32>
    %69 = vector.multi_reduction <add>, %68, %cst_29 [1] : vector<16x32xf32> to vector<16xf32>
    %70 = vector.shape_cast %69 : vector<16xf32> to vector<16x1xf32>
    %cst_30 = arith.constant 3.125000e-02 : f32
    %71 = vector.broadcast %cst_30 : f32 to vector<16x1xf32>
    %72 = arith.mulf %67, %71 : vector<16x1xf32>
    %cst_31 = arith.constant 3.125000e-02 : f32
    %73 = vector.broadcast %cst_31 : f32 to vector<16x1xf32>
    %74 = arith.mulf %70, %73 : vector<16x1xf32>
    %75 = arith.mulf %72, %72 : vector<16x1xf32>
    %76 = arith.subf %74, %75 : vector<16x1xf32>
    %cst_32 = arith.constant 0.000000e+00 : f32
    %77 = vector.broadcast %cst_32 : f32 to vector<16x1xf32>
    %78 = arith.maximumf %76, %77 : vector<16x1xf32>
    %c288 = arith.constant 288 : index
    %c0_33 = arith.constant 0 : index
    %79 = vector.load %arg2[%c288, %c0_33] : memref<1448x128xf32, #tpu.memory_space<vmem>>, vector<16x1xf32>
    %cst_34 = arith.constant 9.99999974E-6 : f32
    %80 = vector.broadcast %cst_34 : f32 to vector<16x1xf32>
    %81 = arith.addf %78, %80 : vector<16x1xf32>
    %82 = math.rsqrt %81 : vector<16x1xf32>
    %83 = arith.mulf %79, %82 : vector<16x1xf32>
    %84 = vector.broadcast %83 : vector<16x1xf32> to vector<16x32xf32>
    %85 = arith.mulf %65, %84 : vector<16x32xf32>
    %c304 = arith.constant 304 : index
    %c0_35 = arith.constant 0 : index
    %86 = vector.load %arg2[%c304, %c0_35] : memref<1448x128xf32, #tpu.memory_space<vmem>>, vector<16x1xf32>
    %87 = arith.mulf %72, %83 : vector<16x1xf32>
    %88 = arith.subf %86, %87 : vector<16x1xf32>
    %89 = vector.broadcast %88 : vector<16x1xf32> to vector<16x32xf32>
    %90 = arith.addf %85, %89 : vector<16x32xf32>
    %c352 = arith.constant 352 : index
    %c0_36 = arith.constant 0 : index
    %91 = vector.load %arg2[%c352, %c0_36] : memref<1448x128xf32, #tpu.memory_space<vmem>>, vector<1x32xf32>
    %c360 = arith.constant 360 : index
    %c0_37 = arith.constant 0 : index
    %92 = vector.load %arg2[%c360, %c0_37] : memref<1448x128xf32, #tpu.memory_space<vmem>>, vector<1x32xf32>
    %c1_i32_38 = arith.constant 1 : i32
    %93 = tpu.dynamic_rotate %90 by %c1_i32_38 dim 1 : vector<16x32xf32>, i32 -> vector<16x32xf32>
    %94 = vector.broadcast %91 : vector<1x32xf32> to vector<16x32xf32>
    %95 = arith.mulf %93, %94 : vector<16x32xf32>
    %c31_i32 = arith.constant 31 : i32
    %96 = tpu.dynamic_rotate %90 by %c31_i32 dim 1 : vector<16x32xf32>, i32 -> vector<16x32xf32>
    %97 = vector.broadcast %92 : vector<1x32xf32> to vector<16x32xf32>
    %98 = arith.mulf %96, %97 : vector<16x32xf32>
    %99 = tpu.concatenate %95, %90, %98 in 0 : vector<16x32xf32>, vector<16x32xf32>, vector<16x32xf32> -> vector<48x32xf32>
    %c320 = arith.constant 320 : index
    %c0_39 = arith.constant 0 : index
    %100 = vector.load %arg2[%c320, %c0_39] : memref<1448x128xf32, #tpu.memory_space<vmem>>, vector<32x48xf32>
    %cst_40 = arith.constant dense<0.000000e+00> : vector<32x32xf32>
    %101 = tpu.matmul %100, %99, %cst_40 {dimension_numbers = #tpu.dot_dimension_numbers<[1], [0], [0], [1], [0, 0, 1, 1], [], []>} : vector<32x48xf32>, vector<48x32xf32>, vector<32x32xf32> -> vector<32x32xf32>
    %c368 = arith.constant 368 : index
    %c0_41 = arith.constant 0 : index
    %102 = vector.load %arg2[%c368, %c0_41] : memref<1448x128xf32, #tpu.memory_space<vmem>>, vector<32x16xf32>
    %cst_42 = arith.constant dense<0.000000e+00> : vector<32x16xf32>
    %103 = tpu.matmul %101, %102, %cst_42 {dimension_numbers = #tpu.dot_dimension_numbers<[1], [0], [0], [1], [0, 0, 1, 1], [], []>} : vector<32x32xf32>, vector<32x16xf32>, vector<32x16xf32> -> vector<32x16xf32>
    %c400 = arith.constant 400 : index
    %c0_43 = arith.constant 0 : index
    %104 = vector.load %arg2[%c400, %c0_43] : memref<1448x128xf32, #tpu.memory_space<vmem>>, vector<32x16xf32>
    %105 = arith.addf %103, %104 : vector<32x16xf32>
    %cst_44 = arith.constant 0.000000e+00 : f32
    %106 = vector.broadcast %cst_44 : f32 to vector<32x16xf32>
    %107 = arith.cmpf oge, %105, %106 : vector<32x16xf32>
    %cst_45 = arith.constant 0.00999999977 : f32
    %108 = vector.broadcast %cst_45 : f32 to vector<32x16xf32>
    %109 = arith.mulf %108, %105 : vector<32x16xf32>
    %110 = arith.select %107, %105, %109 : vector<32x16xi1>, vector<32x16xf32>
    %cst_46 = arith.constant dense<0.000000e+00> : vector<32xf32>
    %111 = vector.multi_reduction <add>, %110, %cst_46 [1] : vector<32x16xf32> to vector<32xf32>
    %112 = vector.shape_cast %111 : vector<32xf32> to vector<32x1xf32>
    %113 = arith.mulf %110, %110 : vector<32x16xf32>
    %cst_47 = arith.constant dense<0.000000e+00> : vector<32xf32>
    %114 = vector.multi_reduction <add>, %113, %cst_47 [1] : vector<32x16xf32> to vector<32xf32>
    %115 = vector.shape_cast %114 : vector<32xf32> to vector<32x1xf32>
    %cst_48 = arith.constant 6.250000e-02 : f32
    %116 = vector.broadcast %cst_48 : f32 to vector<32x1xf32>
    %117 = arith.mulf %112, %116 : vector<32x1xf32>
    %cst_49 = arith.constant 6.250000e-02 : f32
    %118 = vector.broadcast %cst_49 : f32 to vector<32x1xf32>
    %119 = arith.mulf %115, %118 : vector<32x1xf32>
    %120 = arith.mulf %117, %117 : vector<32x1xf32>
    %121 = arith.subf %119, %120 : vector<32x1xf32>
    %cst_50 = arith.constant 0.000000e+00 : f32
    %122 = vector.broadcast %cst_50 : f32 to vector<32x1xf32>
    %123 = arith.maximumf %121, %122 : vector<32x1xf32>
    %c432 = arith.constant 432 : index
    %c0_51 = arith.constant 0 : index
    %124 = vector.load %arg2[%c432, %c0_51] : memref<1448x128xf32, #tpu.memory_space<vmem>>, vector<32x1xf32>
    %cst_52 = arith.constant 9.99999974E-6 : f32
    %125 = vector.broadcast %cst_52 : f32 to vector<32x1xf32>
    %126 = arith.addf %123, %125 : vector<32x1xf32>
    %127 = math.rsqrt %126 : vector<32x1xf32>
    %128 = arith.mulf %124, %127 : vector<32x1xf32>
    %129 = vector.broadcast %128 : vector<32x1xf32> to vector<32x16xf32>
    %130 = arith.mulf %110, %129 : vector<32x16xf32>
    %c464 = arith.constant 464 : index
    %c0_53 = arith.constant 0 : index
    %131 = vector.load %arg2[%c464, %c0_53] : memref<1448x128xf32, #tpu.memory_space<vmem>>, vector<32x1xf32>
    %132 = arith.mulf %117, %128 : vector<32x1xf32>
    %133 = arith.subf %131, %132 : vector<32x1xf32>
    %134 = vector.broadcast %133 : vector<32x1xf32> to vector<32x16xf32>
    %135 = arith.addf %130, %134 : vector<32x16xf32>
    %c496 = arith.constant 496 : index
    %c0_54 = arith.constant 0 : index
    %136 = vector.load %arg2[%c496, %c0_54] : memref<1448x128xf32, #tpu.memory_space<vmem>>, vector<128x32xf32>
    %cst_55 = arith.constant dense<0.000000e+00> : vector<128x16xf32>
    %137 = tpu.matmul %136, %135, %cst_55 {dimension_numbers = #tpu.dot_dimension_numbers<[1], [0], [0], [1], [0, 0, 1, 1], [], []>} : vector<128x32xf32>, vector<32x16xf32>, vector<128x16xf32> -> vector<128x16xf32>
    %c624 = arith.constant 624 : index
    %c0_56 = arith.constant 0 : index
    %138 = vector.load %arg2[%c624, %c0_56] : memref<1448x128xf32, #tpu.memory_space<vmem>>, vector<128x16xf32>
    %139 = arith.mulf %137, %138 : vector<128x16xf32>
    %c752 = arith.constant 752 : index
    %c0_57 = arith.constant 0 : index
    %140 = vector.load %arg2[%c752, %c0_57] : memref<1448x128xf32, #tpu.memory_space<vmem>>, vector<16x2xf32>
    %cst_58 = arith.constant dense<0.000000e+00> : vector<128x2xf32>
    %141 = tpu.matmul %139, %140, %cst_58 {dimension_numbers = #tpu.dot_dimension_numbers<[1], [0], [0], [1], [0, 0, 1, 1], [], []>} : vector<128x16xf32>, vector<16x2xf32>, vector<128x2xf32> -> vector<128x2xf32>
    %c768 = arith.constant 768 : index
    %c0_59 = arith.constant 0 : index
    %142 = vector.load %arg2[%c768, %c0_59] : memref<1448x128xf32, #tpu.memory_space<vmem>>, vector<32x128xf32>
    %cst_60 = arith.constant dense<0.000000e+00> : vector<32x2xf32>
    %143 = tpu.matmul %142, %141, %cst_60 {dimension_numbers = #tpu.dot_dimension_numbers<[1], [0], [0], [1], [0, 0, 1, 1], [], []>} : vector<32x128xf32>, vector<128x2xf32>, vector<32x2xf32> -> vector<32x2xf32>
    %c800 = arith.constant 800 : index
    %c0_61 = arith.constant 0 : index
    %144 = vector.load %arg2[%c800, %c0_61] : memref<1448x128xf32, #tpu.memory_space<vmem>>, vector<32x1xf32>
    %145 = vector.broadcast %144 : vector<32x1xf32> to vector<32x2xf32>
    %146 = arith.addf %143, %145 : vector<32x2xf32>
    %147 = vector.extract_strided_slice %146 {offsets = [0, 0], sizes = [16, 2], strides = [1, 1]} : vector<32x2xf32> to vector<16x2xf32>
    %148 = vector.extract_strided_slice %146 {offsets = [16, 0], sizes = [16, 2], strides = [1, 1]} : vector<32x2xf32> to vector<16x2xf32>
    %c0_62 = arith.constant 0 : index
    %c0_63 = arith.constant 0 : index
    %149 = vector.load %arg1[%c0_62, %c0_63] : memref<16x2xf32, #tpu.memory_space<vmem>>, vector<16x2xf32>
    %cst_64 = arith.constant 5.000000e-01 : f32
    %150 = vector.broadcast %cst_64 : f32 to vector<16x2xf32>
    %151 = arith.mulf %150, %148 : vector<16x2xf32>
    %152 = math.exp %151 : vector<16x2xf32>
    %153 = arith.mulf %149, %152 : vector<16x2xf32>
    %154 = arith.addf %147, %153 : vector<16x2xf32>
    %c864 = arith.constant 864 : index
    %c0_65 = arith.constant 0 : index
    %155 = vector.load %arg2[%c864, %c0_65] : memref<1448x128xf32, #tpu.memory_space<vmem>>, vector<128x16xf32>
    %cst_66 = arith.constant dense<0.000000e+00> : vector<128x2xf32>
    %156 = tpu.matmul %155, %154, %cst_66 {dimension_numbers = #tpu.dot_dimension_numbers<[1], [0], [0], [1], [0, 0, 1, 1], [], []>} : vector<128x16xf32>, vector<16x2xf32>, vector<128x2xf32> -> vector<128x2xf32>
    %c992 = arith.constant 992 : index
    %c0_67 = arith.constant 0 : index
    %157 = vector.load %arg2[%c992, %c0_67] : memref<1448x128xf32, #tpu.memory_space<vmem>>, vector<2x16xf32>
    %cst_68 = arith.constant dense<0.000000e+00> : vector<128x16xf32>
    %158 = tpu.matmul %156, %157, %cst_68 {dimension_numbers = #tpu.dot_dimension_numbers<[1], [0], [0], [1], [0, 0, 1, 1], [], []>} : vector<128x2xf32>, vector<2x16xf32>, vector<128x16xf32> -> vector<128x16xf32>
    %c1000 = arith.constant 1000 : index
    %c0_69 = arith.constant 0 : index
    %159 = vector.load %arg2[%c1000, %c0_69] : memref<1448x128xf32, #tpu.memory_space<vmem>>, vector<128x16xf32>
    %160 = arith.mulf %158, %159 : vector<128x16xf32>
    %c832 = arith.constant 832 : index
    %c0_70 = arith.constant 0 : index
    %161 = vector.load %arg2[%c832, %c0_70] : memref<1448x128xf32, #tpu.memory_space<vmem>>, vector<32x128xf32>
    %cst_71 = arith.constant dense<0.000000e+00> : vector<32x16xf32>
    %162 = tpu.matmul %161, %160, %cst_71 {dimension_numbers = #tpu.dot_dimension_numbers<[1], [0], [0], [1], [0, 0, 1, 1], [], []>} : vector<32x128xf32>, vector<128x16xf32>, vector<32x16xf32> -> vector<32x16xf32>
    %c1128 = arith.constant 1128 : index
    %c0_72 = arith.constant 0 : index
    %163 = vector.load %arg2[%c1128, %c0_72] : memref<1448x128xf32, #tpu.memory_space<vmem>>, vector<32x16xf32>
    %164 = arith.addf %162, %163 : vector<32x16xf32>
    %c1160 = arith.constant 1160 : index
    %c0_73 = arith.constant 0 : index
    %165 = vector.load %arg2[%c1160, %c0_73] : memref<1448x128xf32, #tpu.memory_space<vmem>>, vector<48x32xf32>
    %cst_74 = arith.constant dense<0.000000e+00> : vector<48x16xf32>
    %166 = tpu.matmul %165, %164, %cst_74 {dimension_numbers = #tpu.dot_dimension_numbers<[1], [0], [0], [1], [0, 0, 1, 1], [], []>} : vector<48x32xf32>, vector<32x16xf32>, vector<48x16xf32> -> vector<48x16xf32>
    %c1208 = arith.constant 1208 : index
    %c0_75 = arith.constant 0 : index
    %167 = vector.load %arg2[%c1208, %c0_75] : memref<1448x128xf32, #tpu.memory_space<vmem>>, vector<1x16xf32>
    %c1216 = arith.constant 1216 : index
    %c0_76 = arith.constant 0 : index
    %168 = vector.load %arg2[%c1216, %c0_76] : memref<1448x128xf32, #tpu.memory_space<vmem>>, vector<1x16xf32>
    %169 = vector.extract_strided_slice %166 {offsets = [16, 0], sizes = [16, 16], strides = [1, 1]} : vector<48x16xf32> to vector<16x16xf32>
    %170 = vector.extract_strided_slice %166 {offsets = [0, 0], sizes = [16, 16], strides = [1, 1]} : vector<48x16xf32> to vector<16x16xf32>
    %c1_i32_77 = arith.constant 1 : i32
    %171 = tpu.dynamic_rotate %170 by %c1_i32_77 dim 1 : vector<16x16xf32>, i32 -> vector<16x16xf32>
    %172 = vector.broadcast %167 : vector<1x16xf32> to vector<16x16xf32>
    %173 = arith.mulf %171, %172 : vector<16x16xf32>
    %174 = arith.addf %169, %173 : vector<16x16xf32>
    %175 = vector.extract_strided_slice %166 {offsets = [32, 0], sizes = [16, 16], strides = [1, 1]} : vector<48x16xf32> to vector<16x16xf32>
    %c15_i32 = arith.constant 15 : i32
    %176 = tpu.dynamic_rotate %175 by %c15_i32 dim 1 : vector<16x16xf32>, i32 -> vector<16x16xf32>
    %177 = vector.broadcast %168 : vector<1x16xf32> to vector<16x16xf32>
    %178 = arith.mulf %176, %177 : vector<16x16xf32>
    %179 = arith.addf %174, %178 : vector<16x16xf32>
    %c1224 = arith.constant 1224 : index
    %c0_78 = arith.constant 0 : index
    %180 = vector.load %arg2[%c1224, %c0_78] : memref<1448x128xf32, #tpu.memory_space<vmem>>, vector<16x32xf32>
    %cst_79 = arith.constant dense<0.000000e+00> : vector<16x32xf32>
    %181 = tpu.matmul %179, %180, %cst_79 {dimension_numbers = #tpu.dot_dimension_numbers<[1], [0], [0], [1], [0, 0, 1, 1], [], []>} : vector<16x16xf32>, vector<16x32xf32>, vector<16x32xf32> -> vector<16x32xf32>
    %c1240 = arith.constant 1240 : index
    %c0_80 = arith.constant 0 : index
    %182 = vector.load %arg2[%c1240, %c0_80] : memref<1448x128xf32, #tpu.memory_space<vmem>>, vector<16x32xf32>
    %183 = arith.addf %181, %182 : vector<16x32xf32>
    %cst_81 = arith.constant 0.000000e+00 : f32
    %184 = vector.broadcast %cst_81 : f32 to vector<16x32xf32>
    %185 = arith.cmpf oge, %183, %184 : vector<16x32xf32>
    %cst_82 = arith.constant 0.00999999977 : f32
    %186 = vector.broadcast %cst_82 : f32 to vector<16x32xf32>
    %187 = arith.mulf %186, %183 : vector<16x32xf32>
    %188 = arith.select %185, %183, %187 : vector<16x32xi1>, vector<16x32xf32>
    %c1256 = arith.constant 1256 : index
    %c0_83 = arith.constant 0 : index
    %189 = vector.load %arg2[%c1256, %c0_83] : memref<1448x128xf32, #tpu.memory_space<vmem>>, vector<24x16xf32>
    %cst_84 = arith.constant dense<0.000000e+00> : vector<24x32xf32>
    %190 = tpu.matmul %189, %188, %cst_84 {dimension_numbers = #tpu.dot_dimension_numbers<[1], [0], [0], [1], [0, 0, 1, 1], [], []>} : vector<24x16xf32>, vector<16x32xf32>, vector<24x32xf32> -> vector<24x32xf32>
    %c1280 = arith.constant 1280 : index
    %c0_85 = arith.constant 0 : index
    %191 = vector.load %arg2[%c1280, %c0_85] : memref<1448x128xf32, #tpu.memory_space<vmem>>, vector<1x32xf32>
    %c1288 = arith.constant 1288 : index
    %c0_86 = arith.constant 0 : index
    %192 = vector.load %arg2[%c1288, %c0_86] : memref<1448x128xf32, #tpu.memory_space<vmem>>, vector<1x32xf32>
    %193 = vector.extract_strided_slice %190 {offsets = [8, 0], sizes = [8, 32], strides = [1, 1]} : vector<24x32xf32> to vector<8x32xf32>
    %194 = vector.extract_strided_slice %190 {offsets = [0, 0], sizes = [8, 32], strides = [1, 1]} : vector<24x32xf32> to vector<8x32xf32>
    %c1_i32_87 = arith.constant 1 : i32
    %195 = tpu.dynamic_rotate %194 by %c1_i32_87 dim 1 : vector<8x32xf32>, i32 -> vector<8x32xf32>
    %196 = vector.broadcast %191 : vector<1x32xf32> to vector<8x32xf32>
    %197 = arith.mulf %195, %196 : vector<8x32xf32>
    %198 = arith.addf %193, %197 : vector<8x32xf32>
    %199 = vector.extract_strided_slice %190 {offsets = [16, 0], sizes = [8, 32], strides = [1, 1]} : vector<24x32xf32> to vector<8x32xf32>
    %c31_i32_88 = arith.constant 31 : i32
    %200 = tpu.dynamic_rotate %199 by %c31_i32_88 dim 1 : vector<8x32xf32>, i32 -> vector<8x32xf32>
    %201 = vector.broadcast %192 : vector<1x32xf32> to vector<8x32xf32>
    %202 = arith.mulf %200, %201 : vector<8x32xf32>
    %203 = arith.addf %198, %202 : vector<8x32xf32>
    %c1296 = arith.constant 1296 : index
    %c0_89 = arith.constant 0 : index
    %204 = vector.load %arg2[%c1296, %c0_89] : memref<1448x128xf32, #tpu.memory_space<vmem>>, vector<32x64xf32>
    %cst_90 = arith.constant dense<0.000000e+00> : vector<8x64xf32>
    %205 = tpu.matmul %203, %204, %cst_90 {dimension_numbers = #tpu.dot_dimension_numbers<[1], [0], [0], [1], [0, 0, 1, 1], [], []>} : vector<8x32xf32>, vector<32x64xf32>, vector<8x64xf32> -> vector<8x64xf32>
    %c1328 = arith.constant 1328 : index
    %c0_91 = arith.constant 0 : index
    %206 = vector.load %arg2[%c1328, %c0_91] : memref<1448x128xf32, #tpu.memory_space<vmem>>, vector<8x64xf32>
    %207 = arith.addf %205, %206 : vector<8x64xf32>
    %cst_92 = arith.constant 0.000000e+00 : f32
    %208 = vector.broadcast %cst_92 : f32 to vector<8x64xf32>
    %209 = arith.cmpf oge, %207, %208 : vector<8x64xf32>
    %cst_93 = arith.constant 0.00999999977 : f32
    %210 = vector.broadcast %cst_93 : f32 to vector<8x64xf32>
    %211 = arith.mulf %210, %207 : vector<8x64xf32>
    %212 = arith.select %209, %207, %211 : vector<8x64xi1>, vector<8x64xf32>
    %c1336 = arith.constant 1336 : index
    %c0_94 = arith.constant 0 : index
    %213 = vector.load %arg2[%c1336, %c0_94] : memref<1448x128xf32, #tpu.memory_space<vmem>>, vector<24x8xf32>
    %cst_95 = arith.constant dense<0.000000e+00> : vector<24x64xf32>
    %214 = tpu.matmul %213, %212, %cst_95 {dimension_numbers = #tpu.dot_dimension_numbers<[1], [0], [0], [1], [0, 0, 1, 1], [], []>} : vector<24x8xf32>, vector<8x64xf32>, vector<24x64xf32> -> vector<24x64xf32>
    %c1360 = arith.constant 1360 : index
    %c0_96 = arith.constant 0 : index
    %215 = vector.load %arg2[%c1360, %c0_96] : memref<1448x128xf32, #tpu.memory_space<vmem>>, vector<1x64xf32>
    %c1368 = arith.constant 1368 : index
    %c0_97 = arith.constant 0 : index
    %216 = vector.load %arg2[%c1368, %c0_97] : memref<1448x128xf32, #tpu.memory_space<vmem>>, vector<1x64xf32>
    %217 = vector.extract_strided_slice %214 {offsets = [8, 0], sizes = [3, 64], strides = [1, 1]} : vector<24x64xf32> to vector<3x64xf32>
    %218 = vector.extract_strided_slice %214 {offsets = [0, 0], sizes = [3, 64], strides = [1, 1]} : vector<24x64xf32> to vector<3x64xf32>
    %c1_i32_98 = arith.constant 1 : i32
    %219 = tpu.dynamic_rotate %218 by %c1_i32_98 dim 1 : vector<3x64xf32>, i32 -> vector<3x64xf32>
    %220 = vector.broadcast %215 : vector<1x64xf32> to vector<3x64xf32>
    %221 = arith.mulf %219, %220 : vector<3x64xf32>
    %222 = arith.addf %217, %221 : vector<3x64xf32>
    %223 = vector.extract_strided_slice %214 {offsets = [16, 0], sizes = [3, 64], strides = [1, 1]} : vector<24x64xf32> to vector<3x64xf32>
    %c63_i32_99 = arith.constant 63 : i32
    %224 = tpu.dynamic_rotate %223 by %c63_i32_99 dim 1 : vector<3x64xf32>, i32 -> vector<3x64xf32>
    %225 = vector.broadcast %216 : vector<1x64xf32> to vector<3x64xf32>
    %226 = arith.mulf %224, %225 : vector<3x64xf32>
    %227 = arith.addf %222, %226 : vector<3x64xf32>
    %c1376 = arith.constant 1376 : index
    %c0_100 = arith.constant 0 : index
    %228 = vector.load %arg2[%c1376, %c0_100] : memref<1448x128xf32, #tpu.memory_space<vmem>>, vector<64x128xf32>
    %cst_101 = arith.constant dense<0.000000e+00> : vector<3x128xf32>
    %229 = tpu.matmul %227, %228, %cst_101 {dimension_numbers = #tpu.dot_dimension_numbers<[1], [0], [0], [1], [0, 0, 1, 1], [], []>} : vector<3x64xf32>, vector<64x128xf32>, vector<3x128xf32> -> vector<3x128xf32>
    %c1440 = arith.constant 1440 : index
    %c0_102 = arith.constant 0 : index
    %230 = vector.load %arg2[%c1440, %c0_102] : memref<1448x128xf32, #tpu.memory_space<vmem>>, vector<3x128xf32>
    %231 = arith.addf %229, %230 : vector<3x128xf32>
    %c0_103 = arith.constant 0 : index
    %c0_104 = arith.constant 0 : index
    %232 = vector.load %arg3[%c0_103, %c0_104] : memref<3x128xf32, #tpu.memory_space<vmem>>, vector<3x128xf32>
    tpu.vector_store %arg3[%c0_103, %c0_104], %231 {strides = array<i32>} : memref<3x128xf32, #tpu.memory_space<vmem>>, vector<3x128xf32>,
    return
  }
}

</mosaic_0001>

<bundles_post_ra>
// kernel: forward.1
= control target key start
LH: loop header
LB: loop body
LE: loop exit
PB: predicated region body
PF: predicated region fallthrough
CT: control target
= control target key end

     0   :  { %8 = vsyncpa [#allocation3], 0  ;;  %s3718_s12 = smov [#allocation2]   ;;  %s4007_s0 = inlined_call_operand.vmem [shape: f32[3,128], index: 0, kind: input, shape index: {}]   ;;  %s4008_s1 = inlined_call_operand.vmem [shape: f32[16,2], index: 1, kind: input, shape index: {}]   ;;  %s4009_s2 = inlined_call_operand.hbm [shape: f32[1448,128], index: 2, kind: input, shape index: {}]   ;;  %s4010_s3 = inlined_call_operand.vmem [shape: f32[3,128], index: 3, kind: output, shape index: {}]  }
   0x1   :  { %s18_s13 = sshll.u32 %s3718_s12, 4  ;;  %s3694_s16 = scalar_lea.hbm %s4009_s2, 23168  ;;  %s19_s13 = int_to_ptr.vmem [resolvable:$true] %s18_s13 }
   0x2   :  { %p3695_p0 = scmp.ne.s32.totalorder %s4009_s2, %s3694_s16  ;;  %p3698_p1 = scmp.lt.u32.totalorder %s3694_s16, %s4009_s2 }
   0x4   :  { %p3700_p2 = pnand %p3698_p1, %p3695_p0 }
   0x6   :  { %3703 = shalt.err (!%p3700_p2)
}
   0x7   :  { %s3704_s21 = scalar_lea.vmem %s19_s13, 23168  ;;  %p3709_p4 = scmp.lt.s32.totalorder %s19_s13, %s19_s13 }
   0x8   :  { %p3705_p3 = scmp.ne.s32.totalorder %s19_s13, %s3704_s21  ;;  %p3710_p5 = scmp.lt.s32.totalorder %s3704_s21, %s3704_s21 }
   0xa   :  { %p3711_p6 = por %p3710_p5, %p3709_p4 }
   0xc   :  { %p3712_p7 = pnand %p3711_p6, %p3705_p3 }
   0xe   :  { %3715 = shalt.err (!%p3712_p7)
}
   0xf   :  { %s3719_s22 = smov 128   ;;  %s3720_s23 = smov 8  }
  0x10   :  { %24 = dma.hbm_to_vmem [thread:$0]  %s4009_s2, 23168, %s19_s13, [#allocation3], %s3719_s22, %s3719_s22, %s3720_s23  }
  0x11   :  { %3716 = dma.done.wait [#allocation3], 23168  }
  0x12   :  { %3717 = vsyncadd [#allocation3], 4294944128  ;;  %v3721_v0 = vmov 0.0|0.0   ;;  %vm3722_vm0 = vmmov 0   ;;  %v3723_v1 = vmov 0.0   ;;  %s3724_s2 = smov 127  }
  0x13   :  { %3442 = vmatprep.subr.bf16.mxu0 %v3721_v0  ;;  %3446 = vmatprep.subr.bf16.mxu1 %v3721_v0  ;;  %v28_v2 = vld [vmem:[%s4007_s0] sm:$0x7]  ;;  %v133_v3 = vld [vmem:[#allocation2 + $0x18] sm:$0xff]  ;;  %v135_v6 = vld [vmem:[#allocation2 + $0x28] sm:$0xff]  ;;  %s3725_s28 = smov 1   ;;  %vm51_vm1 = vcmask 1042432  }
  0x14   :  { %3076 = vmatprep.mubr.msk.f32.mxu0 %vm3722_vm0, %v3723_v1  ;;  %3111 = vmatprep.mubr.msk.f32.mxu1 %vm3722_vm0, %v3723_v1  ;;  %v134_v4 = vld [vmem:[#allocation2 + $0x20] sm:$0xff]  ;;  %v136_v7 = vld [vmem:[#allocation2 + $0x30] sm:$0xff]  ;;  %v137_v9 = vld [vmem:[#allocation2 + $0x38] sm:$0xff]  ;;  %v46_v31 = vrot.slane %v28_v2, 5  ;;  %vm53_vm2 = vcmask 1045504   ;;  %vm60_vm3 = vcmask 1040384  }
  0x15   :  { %38 = vrot.lane.b32.xlu0 %v28_v2, %s3724_s2  ;;  %v3447_v5 = vpack.c.bf16 %v134_v4, %v133_v3  ;;  %v3450_v8 = vpack.c.bf16 %v136_v7, %v135_v6  ;;  %v138_v10 = vld [vmem:[#allocation2 + $0x40] sm:$0xff]  ;;  %v139_v12 = vld [vmem:[#allocation2 + $0x48] sm:$0xff]  ;;  %v140_v13 = vld [vmem:[#allocation2 + $0x50] sm:$0xff]  ;;  %vm3726_vm4 = vmmov 1   ;;  %vm56_vm6 = vcmask 72704   ;;  %s3728_s0 = smov 63  }
  0x16   :  { %v3453_v11 = vpack.c.bf16 %v138_v10, %v137_v9  ;;  %v3456_v14 = vpack.c.bf16 %v140_v13, %v139_v12  ;;  %v141_v15 = vld [vmem:[#allocation2 + $0x58] sm:$0xff]  ;;  %v142_v16 = vld [vmem:[#allocation2 + $0x60] sm:$0xff]  ;;  %v143_v18 = vld [vmem:[#allocation2 + $0x68] sm:$0xff]  ;;  %vm223_vm8 = vcmask 523264   ;;  %v3727_v50 = vmov 0   ;;  %s3729_s29 = smov 64  }
  0x17   :  { %3448 = vmatpush3.bf16.msra.mxu1 %v3447_v5  ;;  %v3459_v17 = vpack.c.bf16 %v142_v16, %v141_v15  ;;  %v144_v19 = vld [vmem:[#allocation2 + $0x70] sm:$0xff]  ;;  %v145_v21 = vld [vmem:[#allocation2 + $0x78] sm:$0xff]  ;;  %v146_v22 = vld [vmem:[#allocation2 + $0x80] sm:$0xff]  ;;  %3644 = vset.pattern.permute.xlu0 %v3727_v50  ;;  %vm257_vm9 = vcmask 1048064   ;;  %s3730_s30 = smov 62   ;;  %s3731_s4 = smov 65  }
  0x18   :  { %3449 = vmatprep.subr.bf16.mxu1 %v3721_v0  ;;  %v3462_v20 = vpack.c.bf16 %v144_v19, %v143_v18  ;;  %v3465_v23 = vpack.c.bf16 %v146_v22, %v145_v21  ;;  %v147_v24 = vld [vmem:[#allocation2 + $0x88] sm:$0xff]  ;;  %v148_v25 = vld [vmem:[#allocation2 + $0x90] sm:$0xff]  ;;  %vm3444_vm5 = vmpackc.low %vm60_vm3, %vm3726_vm4  ;;  %3645 = vset.pattern.permute.xlu1 %v3727_v50  ;;  %vm300_vm10 = vcmask 195584   ;;  %vm479_vm12 = vcmask 261120   ;;  %s3732_s5 = smov 32   ;;  %s3733_s6 = smov 31  }
  0x19   :  { %31 = vrot.lane.b32.xlu0 %v28_v2, %s3725_s28  ;;  %v3468_v26 = vpack.c.bf16 %v148_v25, %v147_v24  ;;  %v2763_v27 = vld [vmem:[#allocation2 + $0x10] ss:$0 sm:$0xff]  ;;  %v2762_v30 = vld [vmem:[#allocation2 + $0x8] ss:$0 sm:$0xff]  ;;  %v55_v38 = vld [vmem:[#allocation2] sm:$0xff]  ;;  %vm544_vm14 = vcmask 1047808  }
  0x1a   :  { %v149_v41 = vld [vmem:[#allocation2 + $0x98] sm:$0xff]  ;;  %v236_v59 = vld [vmem:[#allocation2 + $0xa0] sm:$0xff]  ;;  %v246_v62 = vld [vmem:[#allocation2 + $0xa8] sm:$0xff]  ;;  %s3734_s7 = smov 30   ;;  %s3735_s8 = smov 97   ;;  %vm613_vm15 = vcmask 392192  }
  0x1b   :  { %3451 = vmatpush3.bf16.msra.mxu1 %v3450_v8  ;;  %v2766_v3 = vld [vmem:[#allocation2 + $0xc0] ss:$0 sm:$0xff]  ;;  %v2767_v10 = vld [vmem:[#allocation2 + $0xc8] ss:$0 sm:$0xff]  ;;  %v288_v19 = vld [vmem:[#allocation2 + $0xb0] sm:$0xff]  ;;  %s3737_s13 = smov 15  }
  0x1c   :  { %3452 = vmatprep.subr.bf16.mxu1 %v3721_v0  ;;  %v382_v25 = vld [vmem:[#allocation2 + $0xd0] sm:$0xff]  ;;  %s3738_s14 = smov 113  }
  0x1f   :  { %3454 = vmatpush3.bf16.msra.mxu1 %v3453_v11 }
  0x20   :  { %3455 = vmatprep.subr.bf16.mxu1 %v3721_v0 }
  0x23   :  { %3457 = vmatpush3.bf16.msra.mxu1 %v3456_v14 }
  0x24   :  { %3458 = vmatprep.subr.bf16.mxu1 %v3721_v0 }
  0x27   :  { %3460 = vmatpush3.bf16.msra.mxu1 %v3459_v17 }
  0x28   :  { %3461 = vmatprep.subr.bf16.mxu1 %v3721_v0 }
  0x2b   :  { %3463 = vmatpush3.bf16.msra.mxu1 %v3462_v20 }
  0x2c   :  { %3464 = vmatprep.subr.bf16.mxu1 %v3721_v0 }
  0x2f   :  { %3466 = vmatpush3.bf16.msra.mxu1 %v3465_v23 }
  0x30   :  { %3467 = vmatprep.subr.bf16.mxu1 %v3721_v0 }
  0x33   :  { %3469 = vmatpush3.bf16.msra.mxu1 %v3468_v26  ;;  %v383_v26 = vld [vmem:[#allocation2 + $0xd8] sm:$0xff] }
  0x87   :  { %v39_v28 = vpop.permute.xlu0 %38 }
  0x88   :  { %v44_v29 = vmul.f32 %v2763_v27, %v39_v28  ;;  %v384_v27 = vld [vmem:[#allocation2 + $0xe0] sm:$0xff]  ;;  %v385_v28 = vld [vmem:[#allocation2 + $0xe8] sm:$0xff] }
  0x8a   :  { %v49_v34 = vrot.slane %v44_v29, 2  ;;  %v3474_v29 = vpack.c.bf16 %v383_v26, %v382_v25 }
  0x8b   :  { %v32_v32 = vpop.permute.xlu0 %31 }
  0x8c   :  { %v37_v33 = vmul.f32 %v2762_v30, %v32_v32  ;;  %v3478_v32 = vpack.c.bf16 %v385_v28, %v384_v27 }
  0x8e   :  { %v52_v35 = vsel %vm51_vm1, %v37_v33, %v46_v31  ;;  %v289_v31 = vld [vmem:[#allocation2 + $0xb8] sm:$0xff]  ;;  %v386_v33 = vld [vmem:[#allocation2 + $0xf0] sm:$0xff] }
  0x8f   :  { %v54_v36 = vsel %vm53_vm2, %v52_v35, %v49_v34  ;;  %vm828_vm2 = vcmask 130048  }
  0x90   :  { %v3443_v37 = vpack.c.bf16 %v49_v34, %v54_v36  ;;  %v387_v34 = vld [vmem:[#allocation2 + $0xf8] sm:$0xff]  ;;  %v388_v36 = vld [vmem:[#allocation2 + $0x100] sm:$0xff] }
  0x91   :  { %v3482_v35 = vpack.c.bf16 %v387_v34, %v386_v33  ;;  %v2773_v33 = vld [vmem:[#allocation2 + $0x168] ss:$0 sm:$0xff] }
  0x92   :  { %3445 = vmatpush3.bf16.msk.msra.mxu0 %vm3444_vm5, %v3443_v37  ;;  %v389_v37 = vld [vmem:[#allocation2 + $0x108] sm:$0xff] }
  0x95   :  { %3077 = vmatmul.mubr.msk.f32.vlgmr.msra.gmra.mrb[0].mxu0 %vm56_vm6, %v55_v38  ;;  %v3486_v38 = vpack.c.bf16 %v389_v37, %v388_v36  ;;  %v2772_v36 = vld [vmem:[#allocation2 + $0x160] ss:$0 sm:$0xff]  ;;  %vm1773_vm6 = vcmask 1041408  }
  0x96   :  { %3120 = vmatprep.mubr.msk.f32.mxu0 %vm300_vm10, %v288_v19 }
 0x168   :  { %v129_v39 = vpop.f32.mrb[0].mxu0 }
 0x169   :  { %v3078_v40 = vpop.f32.mrb[1].mxu0  ;;  %3112 = vmatmul.mubr.f32.vlgmr.msra.gmra.mrb[0].mxu1 %v129_v39 }
 0x23c   :  { %v216_v42 = vpop.f32.mrb[0].mxu1 }
 0x23d   :  { %v217_v43 = vadd.f32 %v216_v42, %v149_v41  ;;  %v3113_v44 = vpop.f32.mrb[1].mxu1  ;;  %v391_v41 = vld [vmem:[#allocation2 + $0x118] sm:$0xff]  ;;  %v390_v42 = vld [vmem:[#allocation2 + $0x110] sm:$0xff] }
 0x23f   :  { %v221_v45 = vmul.f32 0.01, %v217_v43  ;;  %vm220_vm7 = vcmp.ge.f32.partialorder %v217_v43, 0.0 }
 0x241   :  { %v222_v46 = vsel %vm220_vm7, %v217_v43, %v221_v45  ;;  %vm1724_vm7 = vcmask 15360  }
 0x242   :  { %v224_v47 = vsel %vm223_vm8, %v222_v46, 0.0  ;;  %v227_v48 = vmul.f32 %v222_v46, %v222_v46 }
 0x243   :  { %225 = vadd.xlane.f32.xlu1 %v224_v47 }
 0x244   :  { %v228_v49 = vsel %vm223_vm8, %v227_v48, 0.0 }
 0x247   :  { %229 = vadd.xlane.f32.xlu1 %v228_v49 }
 0x2d0   :  { %v226_v51 = vpop.xlane.xlu1 %225 }
 0x2d1   :  { %v231_v52 = vmul.f32 0.015625, %v226_v51 }
 0x2d3   :  { %v233_v54 = vmul.f32 %v231_v52, %v231_v52 }
 0x2d4   :  { %v230_v53 = vpop.xlane.xlu1 %229 }
 0x2d5   :  { %v232_v55 = vmul.f32 0.015625, %v230_v53 }
 0x2d7   :  { %v234_v56 = vsub.f32 %v232_v55, %v233_v54 }
 0x2d9   :  { %v235_v57 = vmax.f32 %v234_v56, 0.0 }
 0x2db   :  { %v237_v58 = vadd.f32 1e-05, %v235_v57 }
 0x2dd   :  { %3676 = vrsqrt.f32 %v237_v58 }
 0x2e7   :  { %v3677_v60 = vpop.eup %3676 }
 0x2e8   :  { %v239_v61 = vmul.f32 %v3677_v60, %v236_v59 }
 0x2ea   :  { %242 = vperm.xlu0 %3644, %v239_v61   ;;  %v247_v63 = vmul.f32 %v239_v61, %v231_v52 }
 0x2ec   :  { %v248_v2 = vsub.f32 %v246_v62, %v247_v63 }
 0x2ee   :  { %251 = vperm.xlu1 %3645, %v248_v2  }
 0x2f2   :  { %269 = vrot.lane.b32.xlu1 %v2766_v3, %s3728_s0 }
 0x369   :  { %v243_v4 = vpop.permute.xlu0 %242 }
 0x36a   :  { %v245_v5 = vmul.f32 %v243_v4, %v222_v46 }
 0x36d   :  { %v252_v6 = vpop.permute.xlu1 %251 }
 0x36e   :  { %v254_v7 = vadd.f32 %v252_v6, %v245_v5 }
 0x370   :  { %258 = vrot.lane.b32.xlu0 %v254_v7, %s3729_s29 }
 0x371   :  { %v270_v13 = vpop.permute.xlu1 %269 }
 0x3e2   :  { %v259_v8 = vpop.permute.xlu0 %258 }
 0x3e3   :  { %v260_v9 = vsel %vm257_vm9, %v259_v8, %v254_v7 }
 0x3e4   :  { %261 = vrot.lane.b32.xlu0 %v260_v9, %s3729_s29 }
 0x3e8   :  { %278 = vrot.lane.b32.xlu0 %v2767_v10, %s3725_s28 }
 0x3ec   :  { %283 = vrot.lane.b32.xlu0 %v254_v7, %s3728_s0 }
 0x456   :  { %v262_v11 = vpop.permute.xlu0 %261 }
 0x457   :  { %v263_v12 = vsel %vm257_vm9, %v262_v11, %v254_v7  ;;  %v504_v11 = vld [vmem:[#allocation2 + $0x120] sm:$0xff] }
 0x458   :  { %v272_v16 = vmul.f32 %v270_v13, %v263_v12 }
 0x45a   :  { %v279_v14 = vpop.permute.xlu0 %278 }
 0x45b   :  { %v281_v15 = vmul.f32 %v279_v14, %v263_v12  ;;  %v524_v14 = vld [vmem:[#allocation2 + $0x130] sm:$0xff] }
 0x45d   :  { %286 = vrot.lane.b32.xlu1 %v281_v15, %s3730_s30  ;;  %v505_v15 = vld [vmem:[#allocation2 + $0x128] sm:$0xff] }
 0x45e   :  { %v284_v17 = vpop.permute.xlu0 %283 }
 0x45f   :  { %v3646_v18 = vpack.i.bf16 %v284_v17, %v272_v16 }
 0x461   :  { %3647 = vrot.lane.b32.xlu0 %v3646_v18, %s3731_s4 }
 0x4cf   :  { %v287_v20 = vpop.permute.xlu1 %286 }
 0x4d0   :  { %295 = vrot.lane.b32.xlu1 %v287_v20, %s3731_s4  ;;  %v525_v20 = vld [vmem:[#allocation2 + $0x138] sm:$0xff] }
 0x4d3   :  { %v3648_v21 = vpop.permute.xlu0 %3647 }
 0x4d4   :  { %v3650_v22 = vunpack.i.h.bf16 %v3648_v21  ;;  %v3649_v23 = vunpack.i.l.bf16 %v3648_v21 }
 0x4d6   :  { %v3470_v24 = vpack.c.bf16 %v3650_v22, %v3649_v23 }
 0x4d8   :  { %3471 = vmatprep.subr.bf16.mxu0 %v3470_v24 }
 0x4d9   :  { %3473 = vmatpush3.bf16.msra.mxu0 %v3470_v24 }
 0x542   :  { %v296_v30 = vpop.permute.xlu1 %295 }
 0x543   :  { %3118 = vmatprep.subr.mxu0 %v296_v30 }
 0x544   :  { %3119 = vmatpush3.msra.mxu0 %v296_v30 }
 0x545   :  { %3121 = vmatmul.mubr.msk.f32.vlgmr.msra.gmra.mrb[2].mxu0 %vm300_vm10, %v289_v31  ;;  %3475 = vmatprep.subr.bf16.mxu0 %v3474_v29  ;;  %vm2168_vm10 = vcmask 1047680  }
 0x546   :  { %3477 = vmatpush3.bf16.msra.mxu0 %v3474_v29 }
 0x547   :  { %3479 = vmatprep.subr.bf16.mxu0 %v3478_v32 }
 0x54a   :  { %3481 = vmatpush3.bf16.msra.mxu0 %v3478_v32 }
 0x54b   :  { %3483 = vmatprep.subr.bf16.mxu0 %v3482_v35 }
 0x54e   :  { %3485 = vmatpush3.bf16.msra.mxu0 %v3482_v35 }
 0x54f   :  { %3487 = vmatprep.subr.bf16.mxu0 %v3486_v38 }
 0x552   :  { %3489 = vmatpush3.bf16.msra.mxu0 %v3486_v38 }
 0x618   :  { %v3122_v39 = vpop.f32.mrb[2].mxu0 }
 0x619   :  { %v373_v40 = vpop.f32.mrb[3].mxu0 }
 0x61a   :  { %3139 = vmatprep.mubr.msk.f32.mxu0 %vm223_vm8, %v373_v40 }
 0x61b   :  { %3140 = vmatmul.mubr.msk.f32.vlgmr.msra.gmra.mrb[4].mxu0 %vm223_vm8, %v3122_v39 }
 0x6ee   :  { %v3141_v43 = vpop.f32.mrb[4].mxu0 }
 0x6ef   :  { %v470_v44 = vadd.f32 %v3141_v43, %v391_v41  ;;  %v464_v45 = vpop.f32.mrb[5].mxu0 }
 0x6f0   :  { %v465_v46 = vadd.f32 %v464_v45, %v390_v42 }
 0x6f1   :  { %v476_v47 = vmul.f32 0.01, %v470_v44  ;;  %vm474_vm11 = vcmp.ge.f32.partialorder %v470_v44, 0.0 }
 0x6f2   :  { %v475_v48 = vmul.f32 0.01, %v465_v46  ;;  %vm473_vm13 = vcmp.ge.f32.partialorder %v465_v46, 0.0 }
 0x6f3   :  { %v478_v49 = vsel %vm474_vm11, %v470_v44, %v476_v47 }
 0x6f4   :  { %v483_v50 = vsel %vm479_vm12, %v478_v49, 0.0  ;;  %v477_v51 = vsel %vm473_vm13, %v465_v46, %v475_v48  ;;  %v487_v55 = vmul.f32 %v478_v49, %v478_v49 }
 0x6f5   :  { %484 = vadd.xlane.f32.xlu1 %v483_v50  ;;  %v480_v52 = vsel %vm479_vm12, %v477_v51, 0.0  ;;  %v486_v53 = vmul.f32 %v477_v51, %v477_v51 }
 0x6f6   :  { %481 = vadd.xlane.f32.xlu0 %v480_v52  ;;  %v491_v56 = vsel %vm479_vm12, %v487_v55, 0.0 }
 0x6f7   :  { %v488_v54 = vsel %vm479_vm12, %v486_v53, 0.0 }
 0x6fa   :  { %489 = vadd.xlane.f32.xlu0 %v488_v54 }
 0x6fe   :  { %492 = vadd.xlane.f32.xlu0 %v491_v56 }
 0x782   :  { %v485_v59 = vpop.xlane.xlu1 %484 }
 0x783   :  { %v482_v57 = vpop.xlane.xlu0 %481  ;;  %v495_v61 = vmul.f32 0.03125, %v485_v59  ;;  %v713_v59 = vld [vmem:[#allocation2 + $0x180] sm:$0xff] }
 0x784   :  { %v494_v58 = vmul.f32 0.03125, %v482_v57  ;;  %v711_v57 = vld [vmem:[#allocation2 + $0x170] sm:$0xff] }
 0x785   :  { %v499_v4 = vmul.f32 %v495_v61, %v495_v61 }
 0x786   :  { %v498_v62 = vmul.f32 %v494_v58, %v494_v58 }
 0x787   :  { %v490_v60 = vpop.xlane.xlu0 %489 }
 0x788   :  { %v496_v63 = vmul.f32 0.03125, %v490_v60 }
 0x78a   :  { %v500_v2 = vsub.f32 %v496_v63, %v498_v62  ;;  %v714_v63 = vld [vmem:[#allocation2 + $0x188] sm:$0xff] }
 0x78b   :  { %v493_v3 = vpop.xlane.xlu0 %492 }
 0x78c   :  { %v502_v5 = vmax.f32 %v500_v2, 0.0  ;;  %v497_v6 = vmul.f32 0.03125, %v493_v3  ;;  %v3506_v3 = vpack.c.bf16 %v714_v63, %v713_v59 }
 0x78e   :  { %v506_v7 = vadd.f32 1e-05, %v502_v5  ;;  %v501_v8 = vsub.f32 %v497_v6, %v499_v4 }
 0x790   :  { %3678 = vrsqrt.f32 %v506_v7  ;;  %v503_v9 = vmax.f32 %v501_v8, 0.0 }
 0x792   :  { %v507_v10 = vadd.f32 1e-05, %v503_v9  ;;  %v590_v9 = vld [vmem:[#allocation2 + $0x148] sm:$0xff] }
 0x794   :  { %3680 = vrsqrt.f32 %v507_v10  ;;  %v591_v10 = vld [vmem:[#allocation2 + $0x150] sm:$0xff] }
 0x79a   :  { %v3679_v12 = vpop.eup %3678 }
 0x79b   :  { %v510_v13 = vmul.f32 %v3679_v12, %v504_v11  ;;  %v592_v11 = vld [vmem:[#allocation2 + $0x158] sm:$0xff] }
 0x79d   :  { %514 = vperm.xlu1 %3645, %v510_v13   ;;  %v526_v16 = vmul.f32 %v510_v13, %v494_v58  ;;  %v712_v58 = vld [vmem:[#allocation2 + $0x178] sm:$0xff] }
 0x79e   :  { %v3681_v17 = vpop.eup %3680  ;;  %v3502_v62 = vpack.c.bf16 %v712_v58, %v711_v57 }
 0x79f   :  { %v528_v18 = vsub.f32 %v524_v14, %v526_v16  ;;  %v511_v19 = vmul.f32 %v3681_v17, %v505_v15  ;;  %v716_v16 = vld [vmem:[#allocation2 + $0x198] sm:$0xff]  ;;  %v715_v17 = vld [vmem:[#allocation2 + $0x190] sm:$0xff] }
 0x7a0   :  { %3503 = vmatprep.subr.bf16.mxu1 %v3502_v62 }
 0x7a1   :  { %532 = vperm.xlu1 %3645, %v528_v18   ;;  %519 = vperm.xlu0 %3644, %v511_v19   ;;  %v527_v21 = vmul.f32 %v511_v19, %v495_v61 }
 0x7a2   :  { %3505 = vmatpush3.bf16.msra.mxu1 %v3502_v62 }
 0x7a3   :  { %v529_v22 = vsub.f32 %v525_v20, %v527_v21  ;;  %3507 = vmatprep.subr.bf16.mxu1 %v3506_v3 }
 0x7a5   :  { %537 = vperm.xlu1 %3645, %v529_v22   ;;  %v718_v22 = vld [vmem:[#allocation2 + $0x1a8] sm:$0xff] }
 0x7a6   :  { %3509 = vmatpush3.bf16.msra.mxu1 %v3506_v3 }
 0x81c   :  { %v515_v23 = vpop.permute.xlu1 %514 }
 0x81d   :  { %v522_v24 = vmul.f32 %v515_v23, %v477_v51  ;;  %v589_v51 = vld [vmem:[#allocation2 + $0x140] sm:$0xff] }
 0x81e   :  { %3154 = vmatprep.mubr.msk.f32.mxu0 %vm613_vm15, %v589_v51 }
 0x820   :  { %v533_v25 = vpop.permute.xlu1 %532  ;;  %v520_v26 = vpop.permute.xlu0 %519 }
 0x821   :  { %v540_v27 = vadd.f32 %v533_v25, %v522_v24  ;;  %v523_v28 = vmul.f32 %v520_v26, %v478_v49  ;;  %v717_v24 = vld [vmem:[#allocation2 + $0x1a0] sm:$0xff] }
 0x823   :  { %545 = vrot.lane.b32.xlu0 %v540_v27, %s3732_s5 }
 0x824   :  { %v538_v29 = vpop.permute.xlu1 %537 }
 0x825   :  { %v541_v30 = vadd.f32 %v538_v29, %v523_v28 }
 0x827   :  { %548 = vrot.lane.b32.xlu1 %v541_v30, %s3732_s5  ;;  %v3651_v37 = vpack.i.bf16 %v541_v30, %v540_v27 }
 0x895   :  { %v546_v31 = vpop.permute.xlu0 %545 }
 0x896   :  { %v547_v32 = vsel %vm544_vm14, %v546_v31, %v540_v27 }
 0x897   :  { %551 = vrot.lane.b32.xlu0 %v547_v32, %s3732_s5 }
 0x899   :  { %v549_v34 = vpop.permute.xlu1 %548 }
 0x89a   :  { %v550_v35 = vsel %vm544_vm14, %v549_v34, %v541_v30 }
 0x89b   :  { %572 = vrot.lane.b32.xlu0 %v2773_v33, %s3725_s28  ;;  %553 = vrot.lane.b32.xlu1 %v550_v35, %s3732_s5 }
 0x89f   :  { %3652 = vrot.lane.b32.xlu0 %v3651_v37, %s3733_s6  ;;  %562 = vrot.lane.b32.xlu1 %v2772_v36, %s3733_s6 }
 0x909   :  { %v552_v38 = vpop.permute.xlu0 %551 }
 0x90a   :  { %v555_v39 = vsel %vm544_vm14, %v552_v38, %v540_v27 }
 0x90d   :  { %v573_v40 = vpop.permute.xlu0 %572  ;;  %v554_v41 = vpop.permute.xlu1 %553 }
 0x90e   :  { %v575_v42 = vmul.f32 %v573_v40, %v555_v39  ;;  %v556_v43 = vsel %vm544_vm14, %v554_v41, %v541_v30 }
 0x90f   :  { %v576_v44 = vmul.f32 %v573_v40, %v556_v43 }
 0x911   :  { %v3653_v45 = vpop.permute.xlu0 %3652  ;;  %v563_v46 = vpop.permute.xlu1 %562  ;;  %v3656_v47 = vpack.i.bf16 %v576_v44, %v575_v42 }
 0x912   :  { %v565_v48 = vmul.f32 %v563_v46, %v555_v39  ;;  %v566_v49 = vmul.f32 %v563_v46, %v556_v43 }
 0x913   :  { %3657 = vrot.lane.b32.xlu1 %v3656_v47, %s3734_s7 }
 0x914   :  { %v3661_v50 = vpack.i.bf16 %v566_v49, %v565_v48 }
 0x916   :  { %3662 = vrot.lane.b32.xlu0 %v3661_v50, %s3735_s8 }
 0x917   :  { %3667 = vrot.lane.b32.xlu1 %v3653_v45, %s3735_s8 }
 0x985   :  { %v3658_v52 = vpop.permute.xlu1 %3657 }
 0x986   :  { %3672 = vrot.lane.b32.xlu0 %v3658_v52, %s3735_s8 }
 0x988   :  { %v3663_v53 = vpop.permute.xlu0 %3662 }
 0x989   :  { %v3665_v54 = vunpack.i.h.bf16 %v3663_v53  ;;  %v3664_v55 = vunpack.i.l.bf16 %v3663_v53  ;;  %v3668_v56 = vpop.permute.xlu1 %3667 }
 0x98a   :  { %v3670_v60 = vunpack.i.h.bf16 %v3668_v56  ;;  %v3669_v61 = vunpack.i.l.bf16 %v3668_v56 }
 0x98b   :  { %v3490_v2 = vpack.c.bf16 %v3665_v54, %v3664_v55 }
 0x98c   :  { %v3494_v4 = vpack.c.bf16 %v3670_v60, %v3669_v61 }
 0x98d   :  { %3491 = vmatprep.subr.bf16.mxu0 %v3490_v2 }
 0x98e   :  { %3493 = vmatpush3.bf16.msra.mxu0 %v3490_v2 }
 0x98f   :  { %3495 = vmatprep.subr.bf16.mxu0 %v3494_v4 }
 0x992   :  { %3497 = vmatpush3.bf16.msra.mxu0 %v3494_v4 }
 0x9f8   :  { %v3673_v5 = vpop.permute.xlu0 %3672 }
 0x9f9   :  { %v3675_v6 = vunpack.i.h.bf16 %v3673_v5  ;;  %v3674_v7 = vunpack.i.l.bf16 %v3673_v5 }
 0x9fb   :  { %v3498_v8 = vpack.c.bf16 %v3675_v6, %v3674_v7 }
 0x9fd   :  { %3499 = vmatprep.subr.bf16.mxu0 %v3498_v8 }
 0x9fe   :  { %3501 = vmatpush3.bf16.msra.mxu0 %v3498_v8 }
 0xa01   :  { %3155 = vmatmul.mubr.msk.f32.vlgmr.msra.gmra.mrb[6].mxu0 %vm613_vm15, %v590_v9 }
 0xa02   :  { %3157 = vmatprep.mubr.msk.f32.mxu0 %vm613_vm15, %v591_v10 }
 0xa05   :  { %3158 = vmatmul.mubr.msk.f32.gmra.mrb[8].mxu0 %vm613_vm15, %v592_v11 }
 0xad4   :  { %v3156_v12 = vpop.f32.mrb[6].mxu0 }
 0xad5   :  { %v692_v13 = vpop.f32.mrb[7].mxu0 }
 0xad6   :  { %3168 = vmatprep.mubr.msk.f32.mxu1 %vm479_vm12, %v692_v13 }
 0xad7   :  { %3169 = vmatmul.mubr.msk.f32.vlgmr.msra.gmra.mrb[2].mxu1 %vm479_vm12, %v3156_v12 }
 0xad8   :  { %v3159_v14 = vpop.f32.mrb[8].mxu0 }
 0xad9   :  { %v702_v15 = vpop.f32.mrb[9].mxu0 }
 0xada   :  { %3171 = vmatprep.mubr.msk.f32.mxu1 %vm479_vm12, %v702_v15 }
 0xadb   :  { %3172 = vmatmul.mubr.msk.f32.gmra.mrb[4].mxu1 %vm479_vm12, %v3159_v14 }
 0xbaa   :  { %v3170_v18 = vpop.f32.mrb[2].mxu1 }
 0xbab   :  { %v803_v19 = vadd.f32 %v3170_v18, %v716_v16  ;;  %v797_v20 = vpop.f32.mrb[3].mxu1  ;;  %v877_v18 = vld [vmem:[#allocation2 + $0x1b0] sm:$0xff] }
 0xbac   :  { %v798_v21 = vadd.f32 %v797_v20, %v715_v17 }
 0xbad   :  { %v821_v23 = vmul.f32 0.01, %v803_v19  ;;  %vm817_vm1 = vcmp.ge.f32.partialorder %v803_v19, 0.0 }
 0xbae   :  { %v820_v25 = vmul.f32 0.01, %v798_v21  ;;  %v3173_v26 = vpop.f32.mrb[4].mxu1  ;;  %vm816_vm3 = vcmp.ge.f32.partialorder %v798_v21, 0.0 }
 0xbaf   :  { %v813_v27 = vadd.f32 %v3173_v26, %v718_v22  ;;  %v807_v28 = vpop.f32.mrb[5].mxu1  ;;  %v3830_v29 = vsel %vm817_vm1, %v803_v19, %v821_v23  ;;  %v878_v19 = vld [vmem:[#allocation2 + $0x1b8] sm:$0xff] }
 0xbb0   :  { %v808_v30 = vadd.f32 %v807_v28, %v717_v24  ;;  %v832_v31 = vsel %vm828_vm2, %v3830_v29, 0.0  ;;  %v3834_v32 = vsel %vm816_vm3, %v798_v21, %v820_v25  ;;  %v842_v35 = vmul.f32 %v3830_v29, %v3830_v29  ;;  %v917_v24 = vld [vmem:[#allocation2 + $0x1d0] sm:$0xff]  ;;  %v918_v26 = vld [vmem:[#allocation2 + $0x1d8] sm:$0xff] }
 0xbb1   :  { %833 = vadd.xlane.f32.xlu0 %v832_v31  ;;  %v829_v33 = vsel %vm828_vm2, %v3834_v32, 0.0  ;;  %v841_v34 = vmul.f32 %v3834_v32, %v3834_v32  ;;  %v823_v36 = vmul.f32 0.01, %v813_v27  ;;  %vm819_vm5 = vcmp.ge.f32.partialorder %v813_v27, 0.0  ;;  %v879_v31 = vld [vmem:[#allocation2 + $0x1c0] sm:$0xff] }
 0xbb2   :  { %v822_v37 = vmul.f32 0.01, %v808_v30  ;;  %830 = vadd.xlane.f32.xlu1 %v829_v33  ;;  %vm818_vm4 = vcmp.ge.f32.partialorder %v808_v30, 0.0  ;;  %v848_v39 = vsel %vm828_vm2, %v842_v35, 0.0  ;;  %v880_v33 = vld [vmem:[#allocation2 + $0x1c8] sm:$0xff] }
 0xbb3   :  { %v845_v38 = vsel %vm828_vm2, %v841_v34, 0.0  ;;  %v3846_v41 = vsel %vm819_vm5, %v813_v27, %v823_v36 }
 0xbb4   :  { %v3844_v40 = vsel %vm818_vm4, %v808_v30, %v822_v37  ;;  %v838_v44 = vsel %vm828_vm2, %v3846_v41, 0.0  ;;  %v844_v45 = vmul.f32 %v3846_v41, %v3846_v41 }
 0xbb5   :  { %846 = vadd.xlane.f32.xlu0 %v845_v38  ;;  %v835_v42 = vsel %vm828_vm2, %v3844_v40, 0.0  ;;  %v843_v43 = vmul.f32 %v3844_v40, %v3844_v40  ;;  %v919_v38 = vld [vmem:[#allocation2 + $0x1e0] sm:$0xff] }
 0xbb6   :  { %849 = vadd.xlane.f32.xlu1 %v848_v39  ;;  %v854_v47 = vsel %vm828_vm2, %v844_v45, 0.0  ;;  %v920_v39 = vld [vmem:[#allocation2 + $0x1e8] sm:$0xff] }
 0xbb7   :  { %v851_v46 = vsel %vm828_vm2, %v843_v43, 0.0 }
 0xbb9   :  { %836 = vadd.xlane.f32.xlu0 %v835_v42 }
 0xbba   :  { %839 = vadd.xlane.f32.xlu1 %v838_v44 }
 0xbbd   :  { %852 = vadd.xlane.f32.xlu0 %v851_v46  ;;  %v1396_v46 = vld [vmem:[#allocation2 + $0x338] sm:$0xff] }
 0xbbe   :  { %855 = vadd.xlane.f32.xlu1 %v854_v47  ;;  %v1395_v47 = vld [vmem:[#allocation2 + $0x330] sm:$0xff] }
 0xc3e   :  { %v834_v48 = vpop.xlane.xlu0 %833 }
 0xc3f   :  { %v831_v49 = vpop.xlane.xlu1 %830  ;;  %v858_v50 = vmul.f32 0.0625, %v834_v48  ;;  %v1394_v48 = vld [vmem:[#allocation2 + $0x328] sm:$0xff] }
 0xc40   :  { %v857_v51 = vmul.f32 0.0625, %v831_v49  ;;  %v1393_v49 = vld [vmem:[#allocation2 + $0x320] sm:$0xff] }
 0xc41   :  { %v866_v56 = vmul.f32 %v858_v50, %v858_v50 }
 0xc42   :  { %v865_v52 = vmul.f32 %v857_v51, %v857_v51  ;;  %v847_v53 = vpop.xlane.xlu0 %846 }
 0xc43   :  { %v861_v54 = vmul.f32 0.0625, %v847_v53  ;;  %v850_v55 = vpop.xlane.xlu1 %849 }
 0xc44   :  { %v862_v57 = vmul.f32 0.0625, %v850_v55 }
 0xc45   :  { %v869_v58 = vsub.f32 %v861_v54, %v865_v52 }
 0xc46   :  { %v870_v59 = vsub.f32 %v862_v57, %v866_v56  ;;  %v837_v60 = vpop.xlane.xlu0 %836 }
 0xc47   :  { %v873_v61 = vmax.f32 %v869_v58, 0.0  ;;  %v859_v62 = vmul.f32 0.0625, %v837_v60  ;;  %v840_v63 = vpop.xlane.xlu1 %839 }
 0xc48   :  { %v874_v2 = vmax.f32 %v870_v59, 0.0  ;;  %v860_v3 = vmul.f32 0.0625, %v840_v63 }
 0xc49   :  { %v881_v4 = vadd.f32 1e-05, %v873_v61  ;;  %v867_v7 = vmul.f32 %v859_v62, %v859_v62 }
 0xc4a   :  { %v882_v5 = vadd.f32 1e-05, %v874_v2  ;;  %v853_v6 = vpop.xlane.xlu0 %852  ;;  %v868_v10 = vmul.f32 %v860_v3, %v860_v3 }
 0xc4b   :  { %3682 = vrsqrt.f32 %v881_v4  ;;  %v863_v8 = vmul.f32 0.0625, %v853_v6  ;;  %v856_v9 = vpop.xlane.xlu1 %855  ;;  %v955_v6 = vld [vmem:[#allocation2 + $0x200] sm:$0xff] }
 0xc4c   :  { %3684 = vrsqrt.f32 %v882_v5  ;;  %v864_v11 = vmul.f32 0.0625, %v856_v9  ;;  %v960_v9 = vld [vmem:[#allocation2 + $0x228] sm:$0xff] }
 0xc4d   :  { %v871_v12 = vsub.f32 %v863_v8, %v867_v7  ;;  %v956_v7 = vld [vmem:[#allocation2 + $0x208] sm:$0xff]  ;;  %v957_v8 = vld [vmem:[#allocation2 + $0x210] sm:$0xff] }
 0xc4e   :  { %v872_v13 = vsub.f32 %v864_v11, %v868_v10  ;;  %v961_v10 = vld [vmem:[#allocation2 + $0x230] sm:$0xff]  ;;  %v962_v11 = vld [vmem:[#allocation2 + $0x238] sm:$0xff] }
 0xc4f   :  { %v875_v14 = vmax.f32 %v871_v12, 0.0  ;;  %v963_v12 = vld [vmem:[#allocation2 + $0x240] sm:$0xff] }
 0xc50   :  { %v876_v15 = vmax.f32 %v872_v13, 0.0  ;;  %v964_v13 = vld [vmem:[#allocation2 + $0x248] sm:$0xff] }
 0xc51   :  { %v883_v16 = vadd.f32 1e-05, %v875_v14  ;;  %v965_v14 = vld [vmem:[#allocation2 + $0x250] sm:$0xff] }
 0xc52   :  { %v884_v17 = vadd.f32 1e-05, %v876_v15  ;;  %v966_v15 = vld [vmem:[#allocation2 + $0x258] sm:$0xff] }
 0xc53   :  { %3686 = vrsqrt.f32 %v883_v16  ;;  %v967_v16 = vld [vmem:[#allocation2 + $0x260] sm:$0xff] }
 0xc54   :  { %3688 = vrsqrt.f32 %v884_v17  ;;  %v968_v17 = vld [vmem:[#allocation2 + $0x268] sm:$0xff] }
 0xc55   :  { %v3683_v20 = vpop.eup %3682 }
 0xc56   :  { %v3685_v21 = vpop.eup %3684  ;;  %v889_v22 = vmul.f32 %v3683_v20, %v877_v18  ;;  %v1194_v18 = vld [vmem:[#allocation2 + $0x2f0] sm:$0xff] }
 0xc57   :  { %v890_v23 = vmul.f32 %v3685_v21, %v878_v19  ;;  %v1195_v19 = vld [vmem:[#allocation2 + $0x2f8] sm:$0xff]  ;;  %v1162_v21 = vld [vmem:[#allocation2 + $0x270] sm:$0xff] }
 0xc58   :  { %895 = vperm.xlu0 %3644, %v889_v22   ;;  %v921_v25 = vmul.f32 %v889_v22, %v857_v51  ;;  %v3518_v20 = vpack.c.bf16 %v1195_v19, %v1194_v18 }
 0xc59   :  { %900 = vperm.xlu1 %3645, %v890_v23   ;;  %v922_v27 = vmul.f32 %v890_v23, %v858_v50  ;;  %v953_v50 = vld [vmem:[#allocation2 + $0x1f0] sm:$0xff]  ;;  %v1163_v23 = vld [vmem:[#allocation2 + $0x278] sm:$0xff] }
 0xc5a   :  { %v925_v28 = vsub.f32 %v917_v24, %v921_v25  ;;  %3182 = vmatprep.mubr.msk.f32.mxu0 %vm479_vm12, %v953_v50  ;;  %3519 = vmatprep.subr.bf16.mxu1 %v3518_v20 }
 0xc5b   :  { %v926_v30 = vsub.f32 %v918_v26, %v922_v27  ;;  %3521 = vmatpush3.bf16.msra.mxu1 %v3518_v20  ;;  %v1164_v27 = vld [vmem:[#allocation2 + $0x280] sm:$0xff] }
 0xc5d   :  { %v3687_v34 = vpop.eup %3686  ;;  %931 = vperm.xlu1 %3645, %v925_v28   ;;  %936 = vperm.xlu0 %3644, %v926_v30   ;;  %v1165_v30 = vld [vmem:[#allocation2 + $0x288] sm:$0xff] }
 0xc5e   :  { %v3689_v35 = vpop.eup %3688  ;;  %v891_v36 = vmul.f32 %v3687_v34, %v879_v31 }
 0xc5f   :  { %v892_v37 = vmul.f32 %v3689_v35, %v880_v33  ;;  %v1166_v35 = vld [vmem:[#allocation2 + $0x290] sm:$0xff] }
 0xc60   :  { %v923_v42 = vmul.f32 %v891_v36, %v859_v62 }
 0xc61   :  { %910 = vperm.xlu0 %3644, %v892_v37   ;;  %905 = vperm.xlu1 %3645, %v891_v36   ;;  %v924_v43 = vmul.f32 %v892_v37, %v860_v3  ;;  %v1167_v37 = vld [vmem:[#allocation2 + $0x298] sm:$0xff] }
 0xc62   :  { %v927_v44 = vsub.f32 %v919_v38, %v923_v42 }
 0xc63   :  { %v928_v45 = vsub.f32 %v920_v39, %v924_v43  ;;  %v1168_v43 = vld [vmem:[#allocation2 + $0x2a0] sm:$0xff] }
 0xc65   :  { %946 = vperm.xlu0 %3644, %v928_v45   ;;  %941 = vperm.xlu1 %3645, %v927_v44   ;;  %v1169_v45 = vld [vmem:[#allocation2 + $0x2a8] sm:$0xff] }
 0xc69   :  { %1414 = vperm.xlu0 %3644, %v1396_v46   ;;  %1409 = vperm.xlu1 %3645, %v1395_v47  }
 0xc6d   :  { %1404 = vperm.xlu0 %3644, %v1394_v48   ;;  %1399 = vperm.xlu1 %3645, %v1393_v49   ;;  %v1170_v49 = vld [vmem:[#allocation2 + $0x2b0] sm:$0xff] }
 0xcd7   :  { %v896_v51 = vpop.permute.xlu0 %895 }
 0xcd8   :  { %v901_v52 = vpop.permute.xlu1 %900  ;;  %v913_v53 = vmul.f32 %v896_v51, %v3834_v32  ;;  %v1171_v51 = vld [vmem:[#allocation2 + $0x2b8] sm:$0xff] }
 0xcd9   :  { %v914_v54 = vmul.f32 %v901_v52, %v3830_v29  ;;  %v954_v29 = vld [vmem:[#allocation2 + $0x1f8] sm:$0xff] }
 0xcdc   :  { %v932_v55 = vpop.permute.xlu1 %931  ;;  %v937_v56 = vpop.permute.xlu0 %936 }
 0xcdd   :  { %v949_v57 = vadd.f32 %v932_v55, %v913_v53  ;;  %v950_v58 = vadd.f32 %v937_v56, %v914_v54  ;;  %v1172_v55 = vld [vmem:[#allocation2 + $0x2c0] sm:$0xff] }
 0xcdf   :  { %v3510_v59 = vpack.c.bf16 %v950_v58, %v949_v57  ;;  %v1173_v57 = vld [vmem:[#allocation2 + $0x2c8] sm:$0xff] }
 0xce0   :  { %v906_v60 = vpop.permute.xlu1 %905  ;;  %v911_v61 = vpop.permute.xlu0 %910 }
 0xce1   :  { %3511 = vmatprep.subr.bf16.mxu0 %v3510_v59  ;;  %v915_v62 = vmul.f32 %v906_v60, %v3844_v40  ;;  %v916_v63 = vmul.f32 %v911_v61, %v3846_v41  ;;  %v958_v40 = vld [vmem:[#allocation2 + $0x218] sm:$0xff]  ;;  %v959_v41 = vld [vmem:[#allocation2 + $0x220] sm:$0xff]  ;;  %v1174_v61 = vld [vmem:[#allocation2 + $0x2d0] sm:$0xff] }
 0xce2   :  { %3513 = vmatpush3.bf16.msra.mxu0 %v3510_v59 }
 0xce4   :  { %v942_v2 = vpop.permute.xlu1 %941  ;;  %v947_v3 = vpop.permute.xlu0 %946 }
 0xce5   :  { %v951_v4 = vadd.f32 %v942_v2, %v915_v62  ;;  %v952_v5 = vadd.f32 %v947_v3, %v916_v63  ;;  %v1175_v63 = vld [vmem:[#allocation2 + $0x2d8] sm:$0xff] }
 0xce7   :  { %v3514_v32 = vpack.c.bf16 %v952_v5, %v951_v4  ;;  %v1176_v5 = vld [vmem:[#allocation2 + $0x2e0] sm:$0xff] }
 0xce9   :  { %3515 = vmatprep.subr.bf16.mxu0 %v3514_v32 }
 0xcea   :  { %3517 = vmatpush3.bf16.msra.mxu0 %v3514_v32 }
 0xced   :  { %3183 = vmatmul.mubr.msk.f32.vlgmr.msra.gmra.mrb[10].mxu0 %vm479_vm12, %v954_v29  ;;  %v1177_v29 = vld [vmem:[#allocation2 + $0x2e8] sm:$0xff] }
 0xcee   :  { %3185 = vmatprep.mubr.msk.f32.mxu0 %vm479_vm12, %v955_v6 }
 0xcf1   :  { %3186 = vmatmul.mubr.msk.f32.gmra.mrb[12].mxu0 %vm479_vm12, %v956_v7 }
 0xcf2   :  { %3188 = vmatprep.mubr.msk.f32.mxu0 %vm479_vm12, %v957_v8 }
 0xcf5   :  { %3189 = vmatmul.mubr.msk.f32.gmra.mrb[14].mxu0 %vm479_vm12, %v958_v40  ;;  %v1389_v40 = vld [vmem:[#allocation2 + $0x300] sm:$0xff] }
 0xcf6   :  { %3191 = vmatprep.mubr.msk.f32.mxu0 %vm479_vm12, %v959_v41 }
 0xcf9   :  { %3192 = vmatmul.mubr.msk.f32.gmra.mrb[16].mxu0 %vm479_vm12, %v960_v9 }
 0xcfa   :  { %3194 = vmatprep.mubr.msk.f32.mxu0 %vm479_vm12, %v961_v10 }
 0xcfd   :  { %3195 = vmatmul.mubr.msk.f32.gmra.mrb[18].mxu0 %vm479_vm12, %v962_v11 }
 0xcfe   :  { %3197 = vmatprep.mubr.msk.f32.mxu0 %vm479_vm12, %v963_v12 }
 0xd01   :  { %3198 = vmatmul.mubr.msk.f32.gmra.mrb[20].mxu0 %vm479_vm12, %v964_v13 }
 0xd02   :  { %3200 = vmatprep.mubr.msk.f32.mxu0 %vm479_vm12, %v965_v14 }
 0xd05   :  { %3201 = vmatmul.mubr.msk.f32.gmra.mrb[22].mxu0 %vm479_vm12, %v966_v15 }
 0xd06   :  { %3203 = vmatprep.mubr.msk.f32.mxu0 %vm479_vm12, %v967_v16 }
 0xd09   :  { %3204 = vmatmul.mubr.msk.f32.gmra.mrb[24].mxu0 %vm479_vm12, %v968_v17 }
 0xd0a   :  { %3266 = vmatprep.mubr.f32.mxu0 %v1389_v40  ;;  %v1523_v40 = vld [vmem:[#allocation2 + $0x3a8] sm:$0xff] }
 0xdc0   :  { %v3184_v22 = vpop.f32.mrb[10].mxu0 }
 0xdc1   :  { %v1083_v24 = vpop.f32.mrb[11].mxu0  ;;  %v1179_v26 = vmul.f32 %v3184_v22, %v1163_v23 }
 0xdc2   :  { %v1178_v25 = vmul.f32 %v1162_v21, %v1083_v24 }
 0xdc4   :  { %v3187_v28 = vpop.f32.mrb[12].mxu0  ;;  %3210 = vmatprep.mubr.msk.f32.mxu1 %vm828_vm2, %v1178_v25 }
 0xdc5   :  { %v1093_v31 = vpop.f32.mrb[13].mxu0  ;;  %3211 = vmatmul.mubr.msk.f32.vlgmr.msra.gmra.mrb[6].mxu1 %vm828_vm2, %v1179_v26  ;;  %v1181_v34 = vmul.f32 %v3187_v28, %v1165_v30 }
 0xdc6   :  { %v1180_v33 = vmul.f32 %v1164_v27, %v1093_v31 }
 0xdc8   :  { %v3190_v36 = vpop.f32.mrb[14].mxu0  ;;  %3213 = vmatprep.mubr.msk.f32.mxu1 %vm828_vm2, %v1180_v33 }
 0xdc9   :  { %v1103_v38 = vpop.f32.mrb[15].mxu0  ;;  %3214 = vmatmul.mubr.msk.f32.gmra.mrb[8].mxu1 %vm828_vm2, %v1181_v34  ;;  %v1183_v42 = vmul.f32 %v3190_v36, %v1167_v37  ;;  %v1390_v34 = vld [vmem:[#allocation2 + $0x308] sm:$0xff]  ;;  %v1392_v36 = vld [vmem:[#allocation2 + $0x318] sm:$0xff]  ;;  %v1514_v37 = vld [vmem:[#allocation2 + $0x360] sm:$0xff] }
 0xdca   :  { %v1182_v39 = vmul.f32 %v1166_v35, %v1103_v38  ;;  %v1391_v35 = vld [vmem:[#allocation2 + $0x310] sm:$0xff] }
 0xdcc   :  { %v3193_v44 = vpop.f32.mrb[16].mxu0  ;;  %3216 = vmatprep.mubr.msk.f32.mxu1 %vm828_vm2, %v1182_v39 }
 0xdcd   :  { %v1113_v46 = vpop.f32.mrb[17].mxu0  ;;  %3217 = vmatmul.mubr.msk.f32.gmra.mrb[10].mxu1 %vm828_vm2, %v1183_v42  ;;  %v1185_v48 = vmul.f32 %v3193_v44, %v1169_v45  ;;  %v1415_v42 = vpop.permute.xlu0 %1414 }
 0xdce   :  { %v1184_v47 = vmul.f32 %v1168_v43, %v1113_v46  ;;  %v1410_v44 = vpop.permute.xlu1 %1409 }
 0xdd0   :  { %v3196_v50 = vpop.f32.mrb[18].mxu0  ;;  %3219 = vmatprep.mubr.msk.f32.mxu1 %vm828_vm2, %v1184_v47 }
 0xdd1   :  { %v1123_v52 = vpop.f32.mrb[19].mxu0  ;;  %3220 = vmatmul.mubr.msk.f32.gmra.mrb[12].mxu1 %vm828_vm2, %v1185_v48  ;;  %v1187_v54 = vmul.f32 %v3196_v50, %v1171_v51 }
 0xdd2   :  { %v1186_v53 = vmul.f32 %v1170_v49, %v1123_v52  ;;  %v1503_v52 = vld [vmem:[%s4008_s1 + $0x8] sm:$0xff] }
 0xdd4   :  { %v3199_v56 = vpop.f32.mrb[20].mxu0  ;;  %3222 = vmatprep.mubr.msk.f32.mxu1 %vm828_vm2, %v1186_v53  ;;  %v1502_v53 = vld [vmem:[%s4008_s1] sm:$0xff]  ;;  %s3736_s1 = smov 16  }
 0xdd5   :  { %v1133_v58 = vpop.f32.mrb[21].mxu0  ;;  %3223 = vmatmul.mubr.msk.f32.gmra.mrb[14].mxu1 %vm828_vm2, %v1187_v54  ;;  %v1189_v60 = vmul.f32 %v3199_v56, %v1173_v57  ;;  %v1400_v57 = vpop.permute.xlu1 %1399 }
 0xdd6   :  { %v1188_v59 = vmul.f32 %v1172_v55, %v1133_v58  ;;  %v1405_v55 = vpop.permute.xlu0 %1404 }
 0xdd8   :  { %v3202_v62 = vpop.f32.mrb[22].mxu0  ;;  %3225 = vmatprep.mubr.msk.f32.mxu1 %vm828_vm2, %v1188_v59 }
 0xdd9   :  { %v1143_v2 = vpop.f32.mrb[23].mxu0  ;;  %3226 = vmatmul.mubr.msk.f32.gmra.mrb[16].mxu1 %vm828_vm2, %v1189_v60  ;;  %v1191_v4 = vmul.f32 %v3202_v62, %v1175_v63 }
 0xdda   :  { %v1190_v3 = vmul.f32 %v1174_v61, %v1143_v2 }
 0xddc   :  { %v3205_v32 = vpop.f32.mrb[24].mxu0  ;;  %3228 = vmatprep.mubr.msk.f32.mxu1 %vm828_vm2, %v1190_v3  ;;  %v1515_v3 = vld [vmem:[#allocation2 + $0x368] sm:$0xff] }
 0xddd   :  { %v1153_v6 = vpop.f32.mrb[25].mxu0  ;;  %3229 = vmatmul.mubr.msk.f32.gmra.mrb[18].mxu1 %vm828_vm2, %v1191_v4  ;;  %v1193_v8 = vmul.f32 %v3205_v32, %v1177_v29  ;;  %v1516_v4 = vld [vmem:[#allocation2 + $0x370] sm:$0xff]  ;;  %v1518_v32 = vld [vmem:[#allocation2 + $0x380] sm:$0xff]  ;;  %v1519_v29 = vld [vmem:[#allocation2 + $0x388] sm:$0xff] }
 0xdde   :  { %v1192_v7 = vmul.f32 %v1176_v5, %v1153_v6  ;;  %v1517_v5 = vld [vmem:[#allocation2 + $0x378] sm:$0xff]  ;;  %v1520_v6 = vld [vmem:[#allocation2 + $0x390] sm:$0xff] }
 0xde0   :  { %3231 = vmatprep.mubr.msk.f32.mxu1 %vm828_vm2, %v1192_v7  ;;  %v1521_v7 = vld [vmem:[#allocation2 + $0x398] sm:$0xff] }
 0xde1   :  { %3232 = vmatmul.mubr.msk.f32.gmra.mrb[20].mxu1 %vm828_vm2, %v1193_v8  ;;  %v1522_v8 = vld [vmem:[#allocation2 + $0x3a0] sm:$0xff] }
 0xde2   :  { %3276 = vmatprep.mubr.msk.f32.mxu1 %vm828_vm2, %v1514_v37 }
 0xe98   :  { %v3212_v41 = vpop.f32.mrb[6].mxu1 }
 0xe99   :  { %v1310_v9 = vpop.f32.mrb[7].mxu1 }
 0xe9a   :  { %v3522_v10 = vpack.c.bf16 %v3212_v41, %v1310_v9  ;;  %v1524_v41 = vld [vmem:[#allocation2 + $0x3b0] sm:$0xff]  ;;  %v1525_v9 = vld [vmem:[#allocation2 + $0x3b8] sm:$0xff] }
 0xe9c   :  { %v3215_v11 = vpop.f32.mrb[8].mxu1  ;;  %3523 = vmatprep.subr.bf16.mxu0 %v3522_v10 }
 0xe9d   :  { %v1320_v12 = vpop.f32.mrb[9].mxu1  ;;  %3525 = vmatpush3.bf16.msra.mxu0 %v3522_v10  ;;  %v1526_v10 = vld [vmem:[#allocation2 + $0x3c0] sm:$0xff] }
 0xe9e   :  { %v3526_v13 = vpack.c.bf16 %v3215_v11, %v1320_v12  ;;  %v1527_v11 = vld [vmem:[#allocation2 + $0x3c8] sm:$0xff]  ;;  %v1528_v12 = vld [vmem:[#allocation2 + $0x3d0] sm:$0xff] }
 0xea0   :  { %v3218_v14 = vpop.f32.mrb[10].mxu1  ;;  %3527 = vmatprep.subr.bf16.mxu0 %v3526_v13 }
 0xea1   :  { %v1330_v15 = vpop.f32.mrb[11].mxu1  ;;  %3529 = vmatpush3.bf16.msra.mxu0 %v3526_v13  ;;  %v1529_v13 = vld [vmem:[#allocation2 + $0x3d8] sm:$0xff] }
 0xea2   :  { %v3530_v16 = vpack.c.bf16 %v3218_v14, %v1330_v15  ;;  %v1723_v14 = vld [vmem:[#allocation2 + $0x3e0] sm:$0x3] }
 0xea4   :  { %v3221_v17 = vpop.f32.mrb[12].mxu1  ;;  %3531 = vmatprep.subr.bf16.mxu0 %v3530_v16 }
 0xea5   :  { %v1340_v18 = vpop.f32.mrb[13].mxu1  ;;  %3533 = vmatpush3.bf16.msra.mxu0 %v3530_v16 }
 0xea6   :  { %v3534_v19 = vpack.c.bf16 %v3221_v17, %v1340_v18 }
 0xea8   :  { %v3224_v20 = vpop.f32.mrb[14].mxu1  ;;  %3535 = vmatprep.subr.bf16.mxu0 %v3534_v19 }
 0xea9   :  { %v1350_v21 = vpop.f32.mrb[15].mxu1  ;;  %3537 = vmatpush3.bf16.msra.mxu0 %v3534_v19 }
 0xeaa   :  { %v3538_v22 = vpack.c.bf16 %v3224_v20, %v1350_v21 }
 0xeac   :  { %v3227_v23 = vpop.f32.mrb[16].mxu1  ;;  %3539 = vmatprep.subr.bf16.mxu0 %v3538_v22 }
 0xead   :  { %v1360_v24 = vpop.f32.mrb[17].mxu1  ;;  %3541 = vmatpush3.bf16.msra.mxu0 %v3538_v22 }
 0xeae   :  { %v3542_v25 = vpack.c.bf16 %v3227_v23, %v1360_v24 }
 0xeb0   :  { %v3230_v26 = vpop.f32.mrb[18].mxu1  ;;  %3543 = vmatprep.subr.bf16.mxu0 %v3542_v25 }
 0xeb1   :  { %v1370_v27 = vpop.f32.mrb[19].mxu1  ;;  %3545 = vmatpush3.bf16.msra.mxu0 %v3542_v25 }
 0xeb2   :  { %v3546_v28 = vpack.c.bf16 %v3230_v26, %v1370_v27 }
 0xeb4   :  { %v3233_v30 = vpop.f32.mrb[20].mxu1  ;;  %3547 = vmatprep.subr.bf16.mxu0 %v3546_v28 }
 0xeb5   :  { %v1380_v31 = vpop.f32.mrb[21].mxu1  ;;  %3549 = vmatpush3.bf16.msra.mxu0 %v3546_v28 }
 0xeb6   :  { %v3550_v33 = vpack.c.bf16 %v3233_v30, %v1380_v31 }
 0xeb8   :  { %3551 = vmatprep.subr.bf16.mxu0 %v3550_v33 }
 0xeb9   :  { %3553 = vmatpush3.bf16.msra.mxu0 %v3550_v33  ;;  %v1954_v33 = vld [vmem:[#allocation2 + $0x340] sm:$0xff] }
 0xeba   :  { %3300 = vmatprep.subr.msk.mxu0 %vm1773_vm6, %v1723_v14 }
 0xebc   :  { %3267 = vmatmul.mubr.f32.vlgmr.msra.gmra.mrb[26].mxu0 %v1390_v34  ;;  %v1923_v34 = vld [vmem:[#allocation2 + $0x3f0] sm:$0xff] }
 0xebd   :  { %3269 = vmatprep.mubr.f32.mxu0 %v1391_v35  ;;  %3301 = vmatpush3.msk.msra.mxu0 %vm1773_vm6, %v1723_v14  ;;  %v1922_v35 = vld [vmem:[#allocation2 + $0x3e8] sm:$0xff] }
 0xec0   :  { %3270 = vmatmul.mubr.f32.gmra.mrb[28].mxu0 %v1392_v36 }
 0xf8f   :  { %v3268_v38 = vpop.f32.mrb[26].mxu0 }
 0xf90   :  { %v1483_v39 = vpop.f32.mrb[27].mxu0  ;;  %v1489_v58 = vadd.f32 %v3268_v38, %v1405_v55 }
 0xf91   :  { %v1484_v60 = vadd.f32 %v1483_v39, %v1400_v57  ;;  %v1928_v57 = vld [vmem:[#allocation2 + $0x418] sm:$0xff] }
 0xf93   :  { %v3271_v43 = vpop.f32.mrb[28].mxu0 }
 0xf94   :  { %v1499_v45 = vadd.f32 %v3271_v43, %v1415_v42  ;;  %v1493_v46 = vpop.f32.mrb[29].mxu0  ;;  %v1925_v42 = vld [vmem:[#allocation2 + $0x400] sm:$0xff]  ;;  %v1924_v43 = vld [vmem:[#allocation2 + $0x3f8] sm:$0xff] }
 0xf95   :  { %v1494_v47 = vadd.f32 %v1493_v46, %v1410_v44 }
 0xf96   :  { %v1505_v48 = vmul.f32 0.5, %v1499_v45 }
 0xf97   :  { %v1504_v49 = vmul.f32 0.5, %v1494_v47 }
 0xf98   :  { %v1508_v50 = vmul.f32 1.442695, %v1505_v48 }
 0xf99   :  { %v1506_v51 = vmul.f32 1.442695, %v1504_v49  ;;  %v1927_v49 = vld [vmem:[#allocation2 + $0x410] sm:$0xff] }
 0xf9a   :  { %3690 = vpow2.f32 %v1508_v50  ;;  %v1926_v50 = vld [vmem:[#allocation2 + $0x408] sm:$0xff] }
 0xf9b   :  { %3692 = vpow2.f32 %v1506_v51 }
 0xfa4   :  { %v3691_v54 = vpop.eup %3690 }
 0xfa5   :  { %v3693_v56 = vpop.eup %3692  ;;  %v1511_v59 = vmul.f32 %v3691_v54, %v1503_v52 }
 0xfa6   :  { %v1510_v61 = vmul.f32 %v3693_v56, %v1502_v53  ;;  %v1929_v56 = vld [vmem:[#allocation2 + $0x420] sm:$0xff] }
 0xfa7   :  { %v1513_v62 = vadd.f32 %v1511_v59, %v1489_v58 }
 0xfa8   :  { %v1512_v63 = vadd.f32 %v1510_v61, %v1484_v60 }
 0xfaa   :  { %v3554_v2 = vpack.c.bf16 %v1513_v62, %v1512_v63  ;;  %v1931_v63 = vld [vmem:[#allocation2 + $0x430] sm:$0xff] }
 0xfac   :  { %3555 = vmatprep.subr.bf16.mxu1 %v3554_v2 }
 0xfad   :  { %3557 = vmatpush3.bf16.msra.mxu1 %v3554_v2  ;;  %v1930_v2 = vld [vmem:[#allocation2 + $0x428] sm:$0xff] }
 0xfb0   :  { %3277 = vmatmul.mubr.msk.f32.vlgmr.msra.gmra.mrb[22].mxu1 %vm828_vm2, %v1515_v3 }
 0xfb1   :  { %3279 = vmatprep.mubr.msk.f32.mxu1 %vm828_vm2, %v1516_v4 }
 0xfb4   :  { %3280 = vmatmul.mubr.msk.f32.gmra.mrb[24].mxu1 %vm828_vm2, %v1517_v5 }
 0xfb5   :  { %3282 = vmatprep.mubr.msk.f32.mxu1 %vm828_vm2, %v1518_v32 }
 0xfb8   :  { %3283 = vmatmul.mubr.msk.f32.gmra.mrb[26].mxu1 %vm828_vm2, %v1519_v29 }
 0xfb9   :  { %3285 = vmatprep.mubr.msk.f32.mxu1 %vm828_vm2, %v1520_v6  ;;  %v1933_v6 = vld [vmem:[#allocation2 + $0x440] sm:$0xff] }
 0xfbc   :  { %3286 = vmatmul.mubr.msk.f32.gmra.mrb[28].mxu1 %vm828_vm2, %v1521_v7  ;;  %v1932_v7 = vld [vmem:[#allocation2 + $0x438] sm:$0xff] }
 0xfbd   :  { %3288 = vmatprep.mubr.msk.f32.mxu1 %vm828_vm2, %v1522_v8 }
 0xfc0   :  { %3289 = vmatmul.mubr.msk.f32.gmra.mrb[30].mxu1 %vm828_vm2, %v1523_v40 }
 0xfc1   :  { %3291 = vmatprep.mubr.msk.f32.mxu1 %vm828_vm2, %v1524_v41 }
 0xfc4   :  { %3292 = vmatmul.mubr.msk.f32.gmra.mrb[32].mxu1 %vm828_vm2, %v1525_v9 }
 0xfc5   :  { %3294 = vmatprep.mubr.msk.f32.mxu1 %vm828_vm2, %v1526_v10 }
 0xfc8   :  { %3295 = vmatmul.mubr.msk.f32.gmra.mrb[34].mxu1 %vm828_vm2, %v1527_v11  ;;  %v1935_v11 = vld [vmem:[#allocation2 + $0x450] sm:$0xff] }
 0xfc9   :  { %3297 = vmatprep.mubr.msk.f32.mxu1 %vm828_vm2, %v1528_v12  ;;  %v1934_v12 = vld [vmem:[#allocation2 + $0x448] sm:$0xff] }
 0xfcc   :  { %3298 = vmatmul.mubr.msk.f32.gmra.mrb[36].mxu1 %vm828_vm2, %v1529_v13 }
 0xfcd   :  { %3358 = vmatprep.mubr.f32.mxu1 %v1954_v33  ;;  %v1958_v33 = vld [vmem:[#allocation2 + $0x468] sm:$0xff] }
0x1083   :  { %v3278_v15 = vpop.f32.mrb[22].mxu1 }
0x1084   :  { %v1644_v16 = vpop.f32.mrb[23].mxu1 }
0x1085   :  { %3302 = vmatprep.mubr.msk.f32.mxu0 %vm1724_vm7, %v1644_v16 }
0x1086   :  { %3303 = vmatmul.mubr.msk.f32.vlgmr.msra.gmra.mrb[30].mxu0 %vm1724_vm7, %v3278_v15 }
0x1087   :  { %v3281_v17 = vpop.f32.mrb[24].mxu1 }
0x1088   :  { %v1654_v18 = vpop.f32.mrb[25].mxu1 }
0x1089   :  { %3305 = vmatprep.mubr.msk.f32.mxu0 %vm1724_vm7, %v1654_v18  ;;  %v1937_v18 = vld [vmem:[#allocation2 + $0x460] sm:$0xff] }
0x108a   :  { %3306 = vmatmul.mubr.msk.f32.gmra.mrb[32].mxu0 %vm1724_vm7, %v3281_v17 }
0x108b   :  { %v3284_v19 = vpop.f32.mrb[26].mxu1 }
0x108c   :  { %v1664_v20 = vpop.f32.mrb[27].mxu1 }
0x108d   :  { %3308 = vmatprep.mubr.msk.f32.mxu0 %vm1724_vm7, %v1664_v20 }
0x108e   :  { %3309 = vmatmul.mubr.msk.f32.gmra.mrb[34].mxu0 %vm1724_vm7, %v3284_v19  ;;  %v1936_v19 = vld [vmem:[#allocation2 + $0x458] sm:$0xff] }
0x108f   :  { %v3287_v21 = vpop.f32.mrb[28].mxu1 }
0x1090   :  { %v1674_v22 = vpop.f32.mrb[29].mxu1 }
0x1091   :  { %3311 = vmatprep.mubr.msk.f32.mxu0 %vm1724_vm7, %v1674_v22 }
0x1092   :  { %3312 = vmatmul.mubr.msk.f32.gmra.mrb[36].mxu0 %vm1724_vm7, %v3287_v21 }
0x1093   :  { %v3290_v23 = vpop.f32.mrb[30].mxu1 }
0x1094   :  { %v1684_v24 = vpop.f32.mrb[31].mxu1 }
0x1095   :  { %3314 = vmatprep.mubr.msk.f32.mxu0 %vm1724_vm7, %v1684_v24 }
0x1096   :  { %3315 = vmatmul.mubr.msk.f32.gmra.mrb[38].mxu0 %vm1724_vm7, %v3290_v23 }
0x1097   :  { %v3293_v25 = vpop.f32.mrb[32].mxu1 }
0x1098   :  { %v1694_v26 = vpop.f32.mrb[33].mxu1 }
0x1099   :  { %3317 = vmatprep.mubr.msk.f32.mxu0 %vm1724_vm7, %v1694_v26  ;;  %v1955_v26 = vld [vmem:[#allocation2 + $0x348] sm:$0xff] }
0x109a   :  { %3318 = vmatmul.mubr.msk.f32.gmra.mrb[40].mxu0 %vm1724_vm7, %v3293_v25 }
0x109b   :  { %v3296_v27 = vpop.f32.mrb[34].mxu1 }
0x109c   :  { %v1704_v28 = vpop.f32.mrb[35].mxu1 }
0x109d   :  { %3320 = vmatprep.mubr.msk.f32.mxu0 %vm1724_vm7, %v1704_v28  ;;  %v1957_v28 = vld [vmem:[#allocation2 + $0x358] sm:$0xff] }
0x109e   :  { %3321 = vmatmul.mubr.msk.f32.gmra.mrb[42].mxu0 %vm1724_vm7, %v3296_v27  ;;  %v1956_v27 = vld [vmem:[#allocation2 + $0x350] sm:$0xff] }
0x109f   :  { %v3299_v30 = vpop.f32.mrb[36].mxu1 }
0x10a0   :  { %v1714_v31 = vpop.f32.mrb[37].mxu1 }
0x10a1   :  { %3323 = vmatprep.mubr.msk.f32.mxu0 %vm1724_vm7, %v1714_v31  ;;  %v1959_v31 = vld [vmem:[#allocation2 + $0x470] sm:$0xff] }
0x10a2   :  { %3324 = vmatmul.mubr.msk.f32.gmra.mrb[44].mxu0 %vm1724_vm7, %v3299_v30  ;;  %v2047_v30 = vld [vmem:[#allocation2 + $0x488] sm:$0xff] }
0x10a3   :  { %3372 = vmatprep.mubr.msk.f32.mxu0 %vm479_vm12, %v2047_v30  ;;  %v2235_v30 = vld [vmem:[#allocation2 + $0x4d8] sm:$0xff] }
0x1159   :  { %v3304_v36 = vpop.f32.mrb[30].mxu0 }
0x115a   :  { %v1939_v37 = vmul.f32 %v3304_v36, %v1923_v34  ;;  %v1843_v38 = vpop.f32.mrb[31].mxu0 }
0x115b   :  { %v1938_v39 = vmul.f32 %v1922_v35, %v1843_v38  ;;  %v1961_v38 = vld [vmem:[#allocation2 + $0x480] sm:$0xff] }
0x115d   :  { %v3558_v44 = vpack.c.bf16 %v1939_v37, %v1938_v39  ;;  %v3307_v45 = vpop.f32.mrb[32].mxu0  ;;  %v1960_v39 = vld [vmem:[#allocation2 + $0x478] sm:$0xff] }
0x115e   :  { %v1941_v46 = vmul.f32 %v3307_v45, %v1925_v42  ;;  %v1853_v47 = vpop.f32.mrb[33].mxu0 }
0x115f   :  { %v1940_v48 = vmul.f32 %v1924_v43, %v1853_v47  ;;  %3559 = vmatprep.subr.bf16.mxu1 %v3558_v44 }
0x1160   :  { %3561 = vmatpush3.bf16.msra.mxu1 %v3558_v44 }
0x1161   :  { %v3562_v51 = vpack.c.bf16 %v1941_v46, %v1940_v48  ;;  %v3310_v52 = vpop.f32.mrb[34].mxu0  ;;  %v2048_v48 = vld [vmem:[#allocation2 + $0x490] sm:$0xff] }
0x1162   :  { %v1943_v53 = vmul.f32 %v3310_v52, %v1927_v49  ;;  %v1863_v54 = vpop.f32.mrb[35].mxu0  ;;  %v2049_v49 = vld [vmem:[#allocation2 + $0x498] sm:$0xff]  ;;  %v2052_v52 = vld [vmem:[#allocation2 + $0x4b0] sm:$0xff] }
0x1163   :  { %v1942_v55 = vmul.f32 %v1926_v50, %v1863_v54  ;;  %3563 = vmatprep.subr.bf16.mxu1 %v3562_v51  ;;  %v2050_v50 = vld [vmem:[#allocation2 + $0x4a0] sm:$0xff] }
0x1164   :  { %3565 = vmatpush3.bf16.msra.mxu1 %v3562_v51  ;;  %v2051_v51 = vld [vmem:[#allocation2 + $0x4a8] sm:$0xff] }
0x1165   :  { %v3566_v58 = vpack.c.bf16 %v1943_v53, %v1942_v55  ;;  %v3313_v59 = vpop.f32.mrb[36].mxu0 }
0x1166   :  { %v1945_v60 = vmul.f32 %v3313_v59, %v1929_v56  ;;  %v1873_v61 = vpop.f32.mrb[37].mxu0  ;;  %v2853_v59 = vld [vmem:[#allocation2 + $0x4b8] ss:$0 sm:$0xff] }
0x1167   :  { %v1944_v62 = vmul.f32 %v1928_v57, %v1873_v61  ;;  %3567 = vmatprep.subr.bf16.mxu1 %v3566_v58 }
0x1168   :  { %3569 = vmatpush3.bf16.msra.mxu1 %v3566_v58 }
0x1169   :  { %v3570_v3 = vpack.c.bf16 %v1945_v60, %v1944_v62  ;;  %v3316_v4 = vpop.f32.mrb[38].mxu0 }
0x116a   :  { %v1947_v5 = vmul.f32 %v3316_v4, %v1931_v63  ;;  %v1883_v32 = vpop.f32.mrb[39].mxu0 }
0x116b   :  { %v1946_v29 = vmul.f32 %v1930_v2, %v1883_v32  ;;  %3571 = vmatprep.subr.bf16.mxu1 %v3570_v3  ;;  %v2854_v32 = vld [vmem:[#allocation2 + $0x4c0] ss:$0 sm:$0xff] }
0x116c   :  { %3573 = vmatpush3.bf16.msra.mxu1 %v3570_v3 }
0x116d   :  { %v3574_v8 = vpack.c.bf16 %v1947_v5, %v1946_v29  ;;  %v3319_v40 = vpop.f32.mrb[40].mxu0  ;;  %v2233_v29 = vld [vmem:[#allocation2 + $0x4c8] sm:$0xff] }
0x116e   :  { %v1949_v41 = vmul.f32 %v3319_v40, %v1933_v6  ;;  %v1893_v9 = vpop.f32.mrb[41].mxu0  ;;  %v2234_v6 = vld [vmem:[#allocation2 + $0x4d0] sm:$0xff] }
0x116f   :  { %v1948_v10 = vmul.f32 %v1932_v7, %v1893_v9  ;;  %3575 = vmatprep.subr.bf16.mxu1 %v3574_v8  ;;  %v3598_v7 = vpack.c.bf16 %v2234_v6, %v2233_v29 }
0x1170   :  { %3577 = vmatpush3.bf16.msra.mxu1 %v3574_v8 }
0x1171   :  { %v3578_v13 = vpack.c.bf16 %v1949_v41, %v1948_v10  ;;  %v3322_v14 = vpop.f32.mrb[42].mxu0 }
0x1172   :  { %v1951_v15 = vmul.f32 %v3322_v14, %v1935_v11  ;;  %v1903_v16 = vpop.f32.mrb[43].mxu0 }
0x1173   :  { %v1950_v17 = vmul.f32 %v1934_v12, %v1903_v16  ;;  %3579 = vmatprep.subr.bf16.mxu1 %v3578_v13 }
0x1174   :  { %3581 = vmatpush3.bf16.msra.mxu1 %v3578_v13 }
0x1175   :  { %v3582_v20 = vpack.c.bf16 %v1951_v15, %v1950_v17  ;;  %v3325_v21 = vpop.f32.mrb[44].mxu0 }
0x1176   :  { %v1953_v22 = vmul.f32 %v3325_v21, %v1937_v18  ;;  %v1913_v23 = vpop.f32.mrb[45].mxu0 }
0x1177   :  { %v1952_v24 = vmul.f32 %v1936_v19, %v1913_v23  ;;  %3583 = vmatprep.subr.bf16.mxu1 %v3582_v20 }
0x1178   :  { %3585 = vmatpush3.bf16.msra.mxu1 %v3582_v20 }
0x1179   :  { %v3586_v25 = vpack.c.bf16 %v1953_v22, %v1952_v24 }
0x117b   :  { %3587 = vmatprep.subr.bf16.mxu1 %v3586_v25 }
0x117c   :  { %3589 = vmatpush3.bf16.msra.mxu1 %v3586_v25 }
0x117d   :  { %3599 = vmatprep.subr.bf16.mxu1 %v3598_v7 }
0x117f   :  { %3359 = vmatmul.mubr.f32.vlgmr.msra.gmra.mrb[38].mxu1 %v1955_v26 }
0x1180   :  { %3361 = vmatprep.mubr.f32.mxu1 %v1956_v27  ;;  %3601 = vmatpush3.bf16.msra.mxu1 %v3598_v7 }
0x1181   :  { %3602 = vmatprep.subr.bf16.mxu1 %v3721_v0 }
0x1183   :  { %3362 = vmatmul.mubr.f32.gmra.mrb[40].mxu1 %v1957_v28  ;;  %v2236_v28 = vld [vmem:[#allocation2 + $0x4e0] sm:$0xff] }
0x1252   :  { %v3360_v34 = vpop.f32.mrb[38].mxu1 }
0x1253   :  { %v2034_v35 = vadd.f32 %v3360_v34, %v1959_v31  ;;  %v2028_v36 = vpop.f32.mrb[39].mxu1 }
0x1254   :  { %v2029_v37 = vadd.f32 %v2028_v36, %v1958_v33 }
0x1256   :  { %v3590_v42 = vpack.c.bf16 %v2034_v35, %v2029_v37  ;;  %v3363_v43 = vpop.f32.mrb[40].mxu1 }
0x1257   :  { %v2044_v44 = vadd.f32 %v3363_v43, %v1961_v38  ;;  %v2038_v45 = vpop.f32.mrb[41].mxu1  ;;  %v2324_v43 = vld [vmem:[#allocation2 + $0x4e8] sm:$0xff] }
0x1258   :  { %v2039_v46 = vadd.f32 %v2038_v45, %v1960_v39  ;;  %3591 = vmatprep.subr.bf16.mxu0 %v3590_v42  ;;  %v2326_v45 = vld [vmem:[#allocation2 + $0x4f8] sm:$0xff] }
0x1259   :  { %3593 = vmatpush3.bf16.msra.mxu0 %v3590_v42 }
0x125a   :  { %v3594_v47 = vpack.c.bf16 %v2044_v44, %v2039_v46  ;;  %v2325_v44 = vld [vmem:[#allocation2 + $0x4f0] sm:$0xff] }
0x125c   :  { %3595 = vmatprep.subr.bf16.mxu0 %v3594_v47 }
0x125d   :  { %3597 = vmatpush3.bf16.msra.mxu0 %v3594_v47 }
0x125e   :  { %3605 = vmatprep.subr.bf16.mxu0 %v3721_v0 }
0x1260   :  { %3373 = vmatmul.mubr.msk.f32.vlgmr.msra.gmra.mrb[46].mxu0 %vm479_vm12, %v2048_v48 }
0x1261   :  { %3375 = vmatprep.mubr.msk.f32.mxu0 %vm479_vm12, %v2049_v49 }
0x1264   :  { %3376 = vmatmul.mubr.msk.f32.gmra.mrb[48].mxu0 %vm479_vm12, %v2050_v50 }
0x1265   :  { %3378 = vmatprep.mubr.msk.f32.mxu0 %vm479_vm12, %v2051_v51 }
0x1268   :  { %3379 = vmatmul.mubr.msk.f32.gmra.mrb[50].mxu0 %vm479_vm12, %v2052_v52  ;;  %v2860_v52 = vld [vmem:[#allocation2 + $0x500] ss:$0 sm:$0xff] }
0x1269   :  { %3409 = vmatprep.mubr.msk.f32.mxu0 %vm3722_vm0, %v3723_v1 }
0x1333   :  { %v3374_v53 = vpop.f32.mrb[46].mxu0 }
0x1334   :  { %2172 = vrot.lane.b32.xlu0 %v3374_v53, %s3736_s1  ;;  %v2137_v54 = vpop.f32.mrb[47].mxu0 }
0x1335   :  { %2169 = vrot.lane.b32.xlu1 %v2137_v54, %s3736_s1 }
0x1337   :  { %v3377_v55 = vpop.f32.mrb[48].mxu0 }
0x1338   :  { %v2147_v56 = vpop.f32.mrb[49].mxu0 }
0x133b   :  { %v3380_v57 = vpop.f32.mrb[50].mxu0 }
0x133c   :  { %2204 = vrot.lane.b32.xlu0 %v3380_v57, %s3736_s1  ;;  %v2157_v58 = vpop.f32.mrb[51].mxu0 }
0x133d   :  { %2201 = vrot.lane.b32.xlu1 %v2157_v58, %s3736_s1 }
0x1341   :  { %2186 = vrot.lane.b32.xlu1 %v2853_v59, %s3737_s13  ;;  %v2459_v59 = vld [vmem:[#allocation2 + $0x518] sm:$0xff] }
0x13a6   :  { %v2173_v60 = vpop.permute.xlu0 %2172 }
0x13a7   :  { %v2170_v61 = vpop.permute.xlu1 %2169  ;;  %v2174_v62 = vsel %vm2168_vm10, %v2173_v60, %v3374_v53  ;;  %v2460_v60 = vld [vmem:[#allocation2 + $0x520] sm:$0xff] }
0x13a8   :  { %2177 = vrot.lane.b32.xlu0 %v2174_v62, %s3736_s1  ;;  %v2171_v63 = vsel %vm2168_vm10, %v2170_v61, %v2137_v54  ;;  %v2461_v62 = vld [vmem:[#allocation2 + $0x528] sm:$0xff] }
0x13a9   :  { %2175 = vrot.lane.b32.xlu1 %v2171_v63, %s3736_s1  ;;  %v3609_v63 = vpack.c.bf16 %v2461_v62, %v2460_v60 }
0x13ae   :  { %v2205_v2 = vpop.permute.xlu0 %2204 }
0x13af   :  { %v2202_v3 = vpop.permute.xlu1 %2201  ;;  %v2206_v4 = vsel %vm2168_vm10, %v2205_v2, %v3380_v57 }
0x13b0   :  { %2209 = vrot.lane.b32.xlu1 %v2206_v4, %s3736_s1  ;;  %v2203_v5 = vsel %vm2168_vm10, %v2202_v3, %v2157_v58 }
0x13b1   :  { %2207 = vrot.lane.b32.xlu0 %v2203_v5, %s3736_s1 }
0x13b3   :  { %v2187_v8 = vpop.permute.xlu1 %2186 }
0x13b5   :  { %2218 = vrot.lane.b32.xlu0 %v2854_v32, %s3725_s28 }
0x141a   :  { %v2178_v40 = vpop.permute.xlu0 %2177 }
0x141b   :  { %v2180_v41 = vsel %vm2168_vm10, %v2178_v40, %v3374_v53  ;;  %v2176_v9 = vpop.permute.xlu1 %2175  ;;  %v2861_v53 = vld [vmem:[#allocation2 + $0x508] ss:$0 sm:$0xff] }
0x141c   :  { %v2190_v10 = vmul.f32 %v2187_v8, %v2180_v41  ;;  %v2179_v11 = vsel %vm2168_vm10, %v2176_v9, %v2137_v54 }
0x141d   :  { %v2189_v12 = vmul.f32 %v2187_v8, %v2179_v11 }
0x141e   :  { %2195 = vrot.lane.b32.xlu0 %v2190_v10, %s3738_s14  ;;  %v2462_v10 = vld [vmem:[#allocation2 + $0x530] sm:$0xff] }
0x141f   :  { %2193 = vrot.lane.b32.xlu1 %v2189_v12, %s3738_s14 }
0x1422   :  { %v2210_v14 = vpop.permute.xlu1 %2209 }
0x1423   :  { %v2208_v13 = vpop.permute.xlu0 %2207  ;;  %v2212_v15 = vsel %vm2168_vm10, %v2210_v14, %v3380_v57 }
0x1424   :  { %v2211_v16 = vsel %vm2168_vm10, %v2208_v13, %v2157_v58  ;;  %v2458_v58 = vld [vmem:[#allocation2 + $0x510] sm:$0xff] }
0x1425   :  { %v3606_v61 = vpack.c.bf16 %v2459_v59, %v2458_v58 }
0x1427   :  { %v2219_v17 = vpop.permute.xlu0 %2218  ;;  %3607 = vmatpush3.bf16.msra.mxu0 %v3606_v61 }
0x1428   :  { %v2221_v18 = vmul.f32 %v2219_v17, %v2211_v16  ;;  %v2222_v19 = vmul.f32 %v2219_v17, %v2212_v15  ;;  %3608 = vmatprep.subr.bf16.mxu0 %v3721_v0  ;;  %v2539_v15 = vld [vmem:[#allocation2 + $0x538] sm:$0xff]  ;;  %v2540_v17 = vld [vmem:[#allocation2 + $0x540] sm:$0xff] }
0x142a   :  { %2225 = vrot.lane.b32.xlu1 %v2221_v18, %s3724_s2  ;;  %2227 = vrot.lane.b32.xlu0 %v2222_v19, %s3724_s2  ;;  %v2541_v18 = vld [vmem:[#allocation2 + $0x548] sm:$0xff] }
0x142b   :  { %3610 = vmatpush3.bf16.msra.mxu0 %v3609_v63 }
0x142c   :  { %3412 = vmatprep.subr.mxu0 %v3723_v1 }
0x1490   :  { %v2196_v20 = vpop.permute.xlu0 %2195 }
0x1491   :  { %v2194_v21 = vpop.permute.xlu1 %2193  ;;  %v2200_v22 = vadd.f32 %v3377_v55, %v2196_v20 }
0x1492   :  { %v2199_v23 = vadd.f32 %v2194_v21, %v2147_v56 }
0x149c   :  { %v2228_v24 = vpop.permute.xlu0 %2227  ;;  %v2226_v25 = vpop.permute.xlu1 %2225 }
0x149d   :  { %v2232_v26 = vadd.f32 %v2228_v24, %v2200_v22  ;;  %v2231_v27 = vadd.f32 %v2226_v25, %v2199_v23  ;;  %v2866_v25 = vld [vmem:[#allocation2 + $0x550] ss:$0 sm:$0xff] }
0x149f   :  { %3385 = vmatprep.mubr.msk.f32.mxu1 %vm828_vm2, %v2231_v27 }
0x14a0   :  { %3386 = vmatmul.mubr.msk.f32.vlgmr.msra.gmra.mrb[42].mxu1 %vm828_vm2, %v2232_v26  ;;  %v2867_v26 = vld [vmem:[#allocation2 + $0x558] ss:$0 sm:$0xff] }
0x14a1   :  { %3392 = vmatprep.mubr.msk.f32.mxu1 %vm3722_vm0, %v3723_v1 }
0x1573   :  { %v3387_v31 = vpop.f32.mrb[42].mxu1 }
0x1574   :  { %v2315_v33 = vadd.f32 %v3387_v31, %v2236_v28  ;;  %v2309_v34 = vpop.f32.mrb[43].mxu1  ;;  %v2675_v28 = vld [vmem:[#allocation2 + $0x568] sm:$0xff] }
0x1575   :  { %v2310_v35 = vadd.f32 %v2309_v34, %v2235_v30  ;;  %v2676_v30 = vld [vmem:[#allocation2 + $0x570] sm:$0xff]  ;;  %v2677_v34 = vld [vmem:[#allocation2 + $0x578] sm:$0xff] }
0x1576   :  { %vm2319_vm11 = vcmp.ge.f32.partialorder %v2315_v33, 0.0  ;;  %v2321_v36 = vmul.f32 0.01, %v2315_v33 }
0x1577   :  { %vm2318_vm13 = vcmp.ge.f32.partialorder %v2310_v35, 0.0  ;;  %v2320_v37 = vmul.f32 0.01, %v2310_v35 }
0x1578   :  { %v2323_v38 = vsel %vm2319_vm11, %v2315_v33, %v2321_v36 }
0x1579   :  { %v2322_v39 = vsel %vm2318_vm13, %v2310_v35, %v2320_v37  ;;  %v3615_v35 = vpack.c.bf16 %v2677_v34, %v2676_v30 }
0x157a   :  { %v3603_v42 = vpack.c.bf16 %v2323_v38, %v2322_v39  ;;  %v2678_v38 = vld [vmem:[#allocation2 + $0x580] sm:$0xff]  ;;  %v2679_v39 = vld [vmem:[#allocation2 + $0x588] sm:$0xff] }
0x157c   :  { %3604 = vmatpush3.bf16.msra.mxu1 %v3603_v42  ;;  %v2680_v42 = vld [vmem:[#allocation2 + $0x590] sm:$0xff] }
0x157d   :  { %3611 = vmatprep.subr.bf16.mxu1 %v3721_v0 }
0x157f   :  { %3393 = vmatmul.mubr.msk.f32.vlgmr.msra.gmra.mrb[44].mxu1 %vm828_vm2, %v2324_v43  ;;  %v3618_v43 = vpack.c.bf16 %v2679_v39, %v2678_v38 }
0x1580   :  { %3395 = vmatprep.mubr.msk.f32.mxu1 %vm3722_vm0, %v3723_v1 }
0x1583   :  { %3396 = vmatmul.mubr.msk.f32.gmra.mrb[46].mxu1 %vm828_vm2, %v2325_v44  ;;  %v2681_v44 = vld [vmem:[#allocation2 + $0x598] sm:$0xff] }
0x1584   :  { %3398 = vmatprep.mubr.msk.f32.mxu1 %vm3722_vm0, %v3723_v1 }
0x1587   :  { %3399 = vmatmul.mubr.msk.f32.gmra.mrb[48].mxu1 %vm828_vm2, %v2326_v45  ;;  %v3621_v45 = vpack.c.bf16 %v2681_v44, %v2680_v42 }
0x1588   :  { %3439 = vmatprep.mubr.msk.f32.mxu1 %vm3722_vm0, %v3723_v1 }
0x1652   :  { %v2402_v46 = vpop.f32.mrb[44].mxu1 }
0x1653   :  { %2418 = vrot.lane.b32.xlu1 %v2402_v46, %s3732_s5  ;;  %v3394_v47 = vpop.f32.mrb[45].mxu1 }
0x1656   :  { %v2407_v48 = vpop.f32.mrb[46].mxu1 }
0x1657   :  { %v3397_v49 = vpop.f32.mrb[47].mxu1 }
0x165a   :  { %v2412_v50 = vpop.f32.mrb[48].mxu1 }
0x165b   :  { %2438 = vrot.lane.b32.xlu0 %v2412_v50, %s3732_s5  ;;  %v3400_v51 = vpop.f32.mrb[49].mxu1 }
0x165f   :  { %2429 = vrot.lane.b32.xlu0 %v2860_v52, %s3733_s6 }
0x1663   :  { %2449 = vrot.lane.b32.xlu0 %v2861_v53, %s3725_s28 }
0x16c5   :  { %v2419_v54 = vpop.permute.xlu1 %2418 }
0x16c6   :  { %v2420_v55 = vsel %vm544_vm14, %v2419_v54, %v2402_v46 }
0x16c7   :  { %2421 = vrot.lane.b32.xlu1 %v2420_v55, %s3732_s5 }
0x16cd   :  { %v2439_v56 = vpop.permute.xlu0 %2438 }
0x16ce   :  { %v2440_v57 = vsel %vm544_vm14, %v2439_v56, %v2412_v50 }
0x16cf   :  { %2441 = vrot.lane.b32.xlu1 %v2440_v57, %s3732_s5 }
0x16d1   :  { %v2430_v2 = vpop.permute.xlu0 %2429 }
0x16d5   :  { %v2450_v32 = vpop.permute.xlu0 %2449 }
0x1739   :  { %v2422_v3 = vpop.permute.xlu1 %2421 }
0x173a   :  { %v2423_v4 = vsel %vm544_vm14, %v2422_v3, %v2402_v46 }
0x173b   :  { %v2432_v5 = vmul.f32 %v2430_v2, %v2423_v4 }
0x173d   :  { %2434 = vrot.lane.b32.xlu1 %v2432_v5, %s3735_s8 }
0x1741   :  { %v2442_v29 = vpop.permute.xlu1 %2441 }
0x1742   :  { %v2443_v6 = vsel %vm544_vm14, %v2442_v29, %v2412_v50  ;;  %vm2542_vm14 = vcmask 64512  }
0x1743   :  { %v2452_v7 = vmul.f32 %v2450_v32, %v2443_v6 }
0x1745   :  { %2454 = vrot.lane.b32.xlu0 %v2452_v7, %s3724_s2 }
0x17af   :  { %v2435_v8 = vpop.permute.xlu1 %2434 }
0x17b0   :  { %v2437_v40 = vadd.f32 %v2435_v8, %v2407_v48 }
0x17b7   :  { %v2455_v41 = vpop.permute.xlu0 %2454 }
0x17b8   :  { %v2457_v9 = vadd.f32 %v2455_v41, %v2437_v40 }
0x17ba   :  { %3410 = vmatmul.mubr.msk.f32.vlgmr.msra.gmra.mrb[52].mxu0 %vm479_vm12, %v2457_v9 }
0x17bb   :  { %3414 = vmatprep.mubr.msk.f32.mxu0 %vm3722_vm0, %v3723_v1 }
0x188d   :  { %v2532_v11 = vpop.f32.mrb[52].mxu0 }
0x188e   :  { %v2533_v12 = vadd.f32 %v2532_v11, %v2462_v10  ;;  %v3411_v13 = vpop.f32.mrb[53].mxu0 }
0x1890   :  { %vm2536_vm15 = vcmp.ge.f32.partialorder %v2533_v12, 0.0  ;;  %v2537_v14 = vmul.f32 0.01, %v2533_v12 }
0x1892   :  { %v2538_v16 = vsel %vm2536_vm15, %v2533_v12, %v2537_v14 }
0x1893   :  { %3413 = vmatpush3.msra.mxu0 %v2538_v16 }
0x1894   :  { %3415 = vmatmul.mubr.msk.f32.vlgmr.msra.gmra.mrb[54].mxu0 %vm2542_vm14, %v2539_v15 }
0x1895   :  { %3417 = vmatprep.mubr.msk.f32.mxu0 %vm3722_vm0, %v3723_v1 }
0x1898   :  { %3418 = vmatmul.mubr.msk.f32.gmra.mrb[56].mxu0 %vm2542_vm14, %v2540_v17 }
0x1899   :  { %3420 = vmatprep.mubr.msk.f32.mxu0 %vm3722_vm0, %v3723_v1  ;;  %v2674_v1 = vld [vmem:[#allocation2 + $0x560] sm:$0xff] }
0x189a   :  { %v3612_v33 = vpack.c.bf16 %v2675_v28, %v2674_v1 }
0x189c   :  { %3421 = vmatmul.mubr.msk.f32.gmra.mrb[58].mxu0 %vm2542_vm14, %v2541_v18  ;;  %3613 = vmatpush3.bf16.msra.mxu1 %v3612_v33 }
0x189d   :  { %3614 = vmatprep.subr.bf16.mxu1 %v3721_v0 }
0x18a0   :  { %3616 = vmatpush3.bf16.msra.mxu1 %v3615_v35 }
0x18a1   :  { %3617 = vmatprep.subr.bf16.mxu1 %v3721_v0 }
0x18a4   :  { %3619 = vmatpush3.bf16.msra.mxu1 %v3618_v43 }
0x18a5   :  { %3620 = vmatprep.subr.bf16.mxu1 %v3721_v0  ;;  %v2682_v0 = vld [vmem:[#allocation2 + $0x5a0] sm:$0x7] }
0x18a8   :  { %3622 = vmatpush3.bf16.msra.mxu1 %v3621_v45 }
0x1967   :  { %v2618_v19 = vpop.f32.mrb[54].mxu0 }
0x1968   :  { %2634 = vrot.lane.b32.xlu1 %v2618_v19, %s3729_s29  ;;  %v3416_v20 = vpop.f32.mrb[55].mxu0 }
0x196b   :  { %v2623_v21 = vpop.f32.mrb[56].mxu0 }
0x196c   :  { %v3419_v22 = vpop.f32.mrb[57].mxu0 }
0x196f   :  { %v2628_v23 = vpop.f32.mrb[58].mxu0 }
0x1970   :  { %2654 = vrot.lane.b32.xlu0 %v2628_v23, %s3729_s29  ;;  %v3422_v24 = vpop.f32.mrb[59].mxu0 }
0x1974   :  { %2645 = vrot.lane.b32.xlu0 %v2866_v25, %s3728_s0 }
0x1978   :  { %2665 = vrot.lane.b32.xlu0 %v2867_v26, %s3725_s28 }
0x19da   :  { %v2635_v27 = vpop.permute.xlu1 %2634 }
0x19db   :  { %v2636_v31 = vsel %vm257_vm9, %v2635_v27, %v2618_v19 }
0x19dc   :  { %2637 = vrot.lane.b32.xlu1 %v2636_v31, %s3729_s29 }
0x19e2   :  { %v2655_v36 = vpop.permute.xlu0 %2654 }
0x19e3   :  { %v2656_v37 = vsel %vm257_vm9, %v2655_v36, %v2628_v23 }
0x19e4   :  { %2657 = vrot.lane.b32.xlu1 %v2656_v37, %s3729_s29 }
0x19e6   :  { %v2646_v46 = vpop.permute.xlu0 %2645 }
0x19ea   :  { %v2666_v50 = vpop.permute.xlu0 %2665 }
0x1a4e   :  { %v2638_v47 = vpop.permute.xlu1 %2637 }
0x1a4f   :  { %v2639_v48 = vsel %vm257_vm9, %v2638_v47, %v2618_v19 }
0x1a50   :  { %v2648_v49 = vmul.f32 %v2646_v46, %v2639_v48 }
0x1a52   :  { %2650 = vrot.lane.b32.xlu1 %v2648_v49, %s3731_s4 }
0x1a56   :  { %v2658_v51 = vpop.permute.xlu1 %2657 }
0x1a57   :  { %v2659_v52 = vsel %vm257_vm9, %v2658_v51, %v2628_v23 }
0x1a58   :  { %v2668_v53 = vmul.f32 %v2666_v50, %v2659_v52 }
0x1a5a   :  { %2670 = vrot.lane.b32.xlu0 %v2668_v53, %s3724_s2 }
0x1ac4   :  { %v2651_v54 = vpop.permute.xlu1 %2650 }
0x1ac5   :  { %v2653_v55 = vadd.f32 %v2651_v54, %v2623_v21 }
0x1acc   :  { %v2671_v56 = vpop.permute.xlu0 %2670 }
0x1acd   :  { %v2673_v57 = vadd.f32 %v2671_v56, %v2653_v55 }
0x1acf   :  { %3440 = vmatmul.mubr.msk.f32.vlgmr.msra.gmra.mrb[50].mxu1 %vm223_vm8, %v2673_v57 }
0x1ba2   :  { %v2752_v58 = vpop.f32.mrb[50].mxu1 }
0x1ba3   :  { %v2753_v59 = vadd.f32 %v2752_v58, %v2682_v0  ;;  %v3441_v60 = vpop.f32.mrb[51].mxu1 }
0x1ba5   :  { %2756 = vst [vmem:[%s4010_s3] sm:$0x7] %v2753_v59 }
0x1ba6   :  { %2761 = vsyncpa [#allocation3], 1 }

</bundles_post_ra>
